<compile_context>
chip_gen: v5e
topology: v5e:2x2
jax: 0.10.0
libtpu: 0.0.40
codegen_flags: <defaults>
</compile_context>

<pallas_src>
import math
import functools

import jax
import jax.numpy as jnp
from jax.experimental import pallas as pl
from jax.experimental.pallas import tpu as pltpu


def _round_up(x, m):
    return ((x + m - 1) // m) * m


# ----------------------------- Pallas kernel -----------------------------

def _moe_expert_kernel(hidden_ref, pie_row_ref, pie_col_ref, aff_col_ref,
                       wg_ref, wu_ref, wd_ref, out_ref,
                       acc_out_ref, ech_ref, acc_e_ref, *, compute_dtype):
    """Grid = (T_tiles, E, K).  One step = (token tile, expert, intermediate tile).

    hidden_ref : (tT, H)    token hidden states for this token tile (compute dtype)
    pie_row_ref: (1, tT)    position_in_expert for this expert (lane layout, int32)
    pie_col_ref: (tT, 1)    position_in_expert for this expert (sublane layout, int32)
    aff_col_ref: (tT, 1)    masked/normalized affinity of each token for this expert
    wg_ref     : (H, tI)    gate projection weight tile
    wu_ref     : (H, tI)    up projection weight tile
    wd_ref     : (tI, H)    down projection weight tile
    out_ref    : (tT, H)    output block (written once, at the last expert/I step)
    acc_out_ref: (tT, H)    f32 combined-output accumulator (resident across e, k)
    ech_ref    : (C, H)     permuted hidden states for this expert (compute dtype)
    acc_e_ref  : (C, H)     f32 per-expert MLP output accumulator (over I tiles)
    """
    e = pl.program_id(1)
    k = pl.program_id(2)
    last_e = pl.num_programs(1) - 1
    last_k = pl.num_programs(2) - 1

    C = ech_ref.shape[0]
    tT = acc_out_ref.shape[0]

    @pl.when(jnp.logical_and(e == 0, k == 0))
    def _():
        acc_out_ref[...] = jnp.zeros_like(acc_out_ref)

    @pl.when(k == 0)
    def _():
        # Build the (C, tT) one-hot permute mask on-chip (no (E,T,C) HBM tensors).
        pie_row = pie_row_ref[...]                                       # (1, tT)
        cap_ct = jax.lax.broadcasted_iota(jnp.int32, (C, tT), 0) + 1     # (C, tT)
        mask_ct = (pie_row == cap_ct).astype(compute_dtype)              # (C, tT)
        # permute: ech[c, h] = sum_t mask[c, t] * hidden[t, h]   (plain MXU matmul)
        ech = jnp.dot(mask_ct, hidden_ref[...], preferred_element_type=jnp.float32)
        ech_ref[...] = ech.astype(compute_dtype)
        acc_e_ref[...] = jnp.zeros_like(acc_e_ref)

    # gate / up projection for this intermediate tile + SiLU GLU + down projection
    ech = ech_ref[...]                                                   # (C, H)
    g = jnp.dot(ech, wg_ref[...], preferred_element_type=jnp.float32)    # (C, tI) f32
    u = jnp.dot(ech, wu_ref[...], preferred_element_type=jnp.float32)    # (C, tI) f32
    inter = (jax.nn.silu(g) * u).astype(compute_dtype)                   # (C, tI)
    acc_e_ref[...] += jnp.dot(inter, wd_ref[...],
                              preferred_element_type=jnp.float32)        # (C, H) f32

    @pl.when(k == last_k)
    def _():
        # un-permute + affinity combine, accumulated in the f32 output scratch
        pie_col = pie_col_ref[...]                                       # (tT, 1)
        cap_tc = jax.lax.broadcasted_iota(jnp.int32, (tT, C), 1) + 1     # (tT, C)
        pm_aff = (pie_col == cap_tc).astype(compute_dtype) * aff_col_ref[...]   # (tT, C)
        acc_out_ref[...] += jnp.dot(pm_aff, acc_e_ref[...].astype(compute_dtype),
                                    preferred_element_type=jnp.float32)  # (tT, H)

    @pl.when(jnp.logical_and(e == last_e, k == last_k))
    def _():
        out_ref[...] = acc_out_ref[...].astype(out_ref.dtype)


# ----------------------------- wrapper (glue) -----------------------------

def expert_mlps_capacity_factor_forward(hidden_states, expert_affinities, expert_index,
                                        w_gate_up, w_down, *, top_k, capacity_factor,
                                        normalize_top_k_affinities=True,
                                        compute_dtype=jnp.bfloat16,
                                        token_tile=256, intermediate_tile=512):
    """JAX/Pallas equivalent of ExpertMLPsCapacityFactor.forward_permute_matmul (no SP)."""
    assert token_tile % 128 == 0 and intermediate_tile % 128 == 0
    S, B, H = hidden_states.shape
    E, _, two_I = w_gate_up.shape
    I = two_I // 2

    out_dtype = hidden_states.dtype
    hs = hidden_states.reshape(-1, H)
    T = hs.shape[0]

    # ---- compute_position_in_expert (cheap routing glue; int32-exact cumsum) ----
    cap = min(math.ceil(T * top_k * capacity_factor / E), T)
    arange_e = jnp.arange(E, dtype=jnp.int32)
    em = jnp.zeros((T, E), jnp.int32)
    for e in range(top_k):
        em = em + (expert_index[:, e][:, None].astype(jnp.int32)
                   == arange_e[None, :]).astype(jnp.int32)
    pie = jnp.cumsum(em, axis=0)
    em = jnp.where(pie > cap, 0, em)
    pie = jnp.where(em == 0, 0, pie).astype(jnp.int32)

    aff = jnp.where(em == 0, 0.0, expert_affinities.astype(jnp.float32))
    if normalize_top_k_affinities:
        denom = jnp.maximum(jnp.sum(jnp.abs(aff), axis=1, keepdims=True), 1e-12)
        aff = aff / denom

    # ---- tiling / padding (lane-dense: T, C padded to 128; I tiled) ----
    tT = min(token_tile, _round_up(T, 128))
    T_pad = _round_up(T, tT)
    C_pad = _round_up(max(cap, 1), 128)         # padded capacity slots contribute exactly 0
    if I <= intermediate_tile:
        tI, I_pad = I, I
    else:
        tI = intermediate_tile
        I_pad = _round_up(I, tI)
    n_t, n_k = T_pad // tT, I_pad // tI

    hs_p = jnp.zeros((T_pad, H), compute_dtype).at[:T].set(hs.astype(compute_dtype))
    pie_p = jnp.zeros((T_pad, E), jnp.int32).at[:T].set(pie)
    aff_p = jnp.zeros((T_pad, E), compute_dtype).at[:T].set(aff.astype(compute_dtype))

    pie_row = jnp.transpose(pie_p)[:, None, :]   # (E, 1, T_pad)  lane layout
    pie_col = jnp.transpose(pie_p)[:, :, None]   # (E, T_pad, 1)  sublane layout
    aff_col = jnp.transpose(aff_p)[:, :, None]   # (E, T_pad, 1)

    # split fused gate/up weight (avoids in-register lane slice) + cast + pad I
    w_gate = w_gate_up[:, :, :I].astype(compute_dtype)
    w_up = w_gate_up[:, :, I:].astype(compute_dtype)
    w_dn = w_down.astype(compute_dtype)
    if I_pad != I:
        w_gate = jnp.pad(w_gate, ((0, 0), (0, 0), (0, I_pad - I)))
        w_up = jnp.pad(w_up, ((0, 0), (0, 0), (0, I_pad - I)))
        w_dn = jnp.pad(w_dn, ((0, 0), (0, I_pad - I), (0, 0)))

    # ---- cost estimate (scheduling hint) ----
    c_item = jnp.dtype(compute_dtype).itemsize
    flops = 4 * E * C_pad * T_pad * H + 6 * E * n_t * C_pad * H * I_pad
    transcendentals = E * n_t * C_pad * I_pad
    bytes_accessed = (T_pad * H * c_item + 2 * E * T_pad * 4 + E * T_pad * c_item
                      + n_t * E * 3 * H * I_pad * c_item
                      + T_pad * H * jnp.dtype(out_dtype).itemsize)

    kernel = functools.partial(_moe_expert_kernel, compute_dtype=compute_dtype)

    out = pl.pallas_call(
        kernel,
        out_shape=jax.ShapeDtypeStruct((T_pad, H), out_dtype),
        grid_spec=pltpu.PrefetchScalarGridSpec(
            num_scalar_prefetch=0,
            grid=(n_t, E, n_k),
            in_specs=[
                pl.BlockSpec((tT, H), lambda t, e, k: (t, 0)),           # hidden
                pl.BlockSpec((None, 1, tT), lambda t, e, k: (e, 0, t)),  # pie (lane)
                pl.BlockSpec((None, tT, 1), lambda t, e, k: (e, t, 0)),  # pie (sublane)
                pl.BlockSpec((None, tT, 1), lambda t, e, k: (e, t, 0)),  # affinities
                pl.BlockSpec((None, H, tI), lambda t, e, k: (e, 0, k)),  # gate weight
                pl.BlockSpec((None, H, tI), lambda t, e, k: (e, 0, k)),  # up weight
                pl.BlockSpec((None, tI, H), lambda t, e, k: (e, k, 0)),  # down weight
            ],
            out_specs=pl.BlockSpec((tT, H), lambda t, e, k: (t, 0)),
            scratch_shapes=[
                pltpu.VMEM((tT, H), jnp.float32),       # combined-output accumulator
                pltpu.VMEM((C_pad, H), compute_dtype),  # permuted hidden states (ech)
                pltpu.VMEM((C_pad, H), jnp.float32),    # per-expert MLP output acc
            ]),
        compiler_params=pltpu.CompilerParams(
            dimension_semantics=("parallel", "arbitrary", "arbitrary"),
            vmem_limit_bytes=64 * 1024 * 1024),
        cost_estimate=pl.CostEstimate(flops=int(flops),
                                      transcendentals=int(transcendentals),
                                      bytes_accessed=int(bytes_accessed)),
    )(hs_p, pie_row, pie_col, aff_col, w_gate, w_up, w_dn)

    # TODO(synk): 'index' permute strategy, forward_full_capacity fast path, and the
    # OPTIMIZED_SP_MATMUL tensor-parallel collectives are not implemented here.
    # TODO(synk): for very large T (many token tiles) a 3-pass variant that builds the
    # full ech once per expert would avoid re-running the expert MLP per token tile.
    return out[:T].reshape(S, B, H)


# ----------------------------- pure-JAX reference -----------------------------

def _reference_forward(hidden_states, expert_affinities, expert_index,
                       w_gate_up, w_down, *, top_k, capacity_factor,
                       normalize_top_k_affinities=True):
    S, B, H = hidden_states.shape
    E, _, two_I = w_gate_up.shape
    I = two_I // 2
    hs = hidden_states.reshape(-1, H)
    T = hs.shape[0]

    cap = min(math.ceil(T * top_k * capacity_factor / E), T)
    arange_e = jnp.arange(E, dtype=jnp.int32)
    em = jnp.zeros((T, E), jnp.int32)
    for e in range(top_k):
        em = em + (expert_index[:, e][:, None].astype(jnp.int32)
                   == arange_e[None, :]).astype(jnp.int32)
    pie = jnp.cumsum(em, axis=0)
    em = jnp.where(pie > cap, 0, em)
    pie = jnp.where(em == 0, 0, pie)
    pmask = (pie[:, :, None] == jnp.arange(cap + 1, dtype=jnp.int32)[None, None, :]
             ).astype(jnp.float32)[:, :, 1:]

    ech = jnp.einsum('tec,th->ech', pmask, hs.astype(jnp.float32))
    gu = jnp.einsum('ech,ehf->ecf', ech, w_gate_up.astype(jnp.float32))
    gate, up = gu[..., :I], gu[..., I:]
    inter = jax.nn.silu(gate) * up
    out_e = jnp.einsum('eci,eih->ech', inter, w_down.astype(jnp.float32))

    aff = jnp.where(em == 0, 0.0, expert_affinities.astype(jnp.float32))
    if normalize_top_k_affinities:
        aff = aff / jnp.maximum(jnp.sum(jnp.abs(aff), axis=1, keepdims=True), 1e-12)
    pm_aff = pmask * aff[:, :, None]
    out = jnp.einsum('tec,ech->th', pm_aff, out_e)
    return out.astype(hidden_states.dtype).reshape(S, B, H)


# ----------------------------- main -----------------------------

if __name__ == "__main__":
    S, B, H, I, E, TOP_K = 8, 2, 32, 64, 8, 2
    CAPACITY_FACTOR = 2.0   # < E/top_k, so the 'matmul' permute path is exercised
    T = S * B

    key = jax.random.PRNGKey(0)
    k_h, k_aff, k_idx, k_wgu, k_wd = jax.random.split(key, 5)

    hidden_states = jax.random.normal(k_h, (S, B, H), dtype=jnp.float32)
    expert_affinities = jax.nn.softmax(
        jax.random.normal(k_aff, (T, E), dtype=jnp.float32), axis=-1)
    expert_index = jax.random.randint(k_idx, (T, TOP_K), 0, E, dtype=jnp.int32)

    bound_gu = math.sqrt(6.0 / H)
    bound_d = math.sqrt(6.0 / I)
    w_gate_up = jax.random.uniform(k_wgu, (E, H, 2 * I), jnp.float32,
                                   minval=-bound_gu, maxval=bound_gu)
    w_down = jax.random.uniform(k_wd, (E, I, H), jnp.float32,
                                minval=-bound_d, maxval=bound_d)

    ref = jax.block_until_ready(_reference_forward(
        hidden_states, expert_affinities, expert_index, w_gate_up, w_down,
        top_k=TOP_K, capacity_factor=CAPACITY_FACTOR,
        normalize_top_k_affinities=True))

    # f32 compute path (tight tolerance)
    out_f32 = jax.block_until_ready(expert_mlps_capacity_factor_forward(
        hidden_states, expert_affinities, expert_index, w_gate_up, w_down,
        top_k=TOP_K, capacity_factor=CAPACITY_FACTOR,
        normalize_top_k_affinities=True, compute_dtype=jnp.float32))
    assert out_f32.shape == (S, B, H)
    assert jnp.allclose(out_f32, ref, atol=1e-3, rtol=1e-3), "f32 Pallas output mismatch"

    # bf16 MXU-operand path (loose tolerance; f32 accumulation inside the kernel)
    out_bf16 = jax.block_until_ready(expert_mlps_capacity_factor_forward(
        hidden_states, expert_affinities, expert_index, w_gate_up, w_down,
        top_k=TOP_K, capacity_factor=CAPACITY_FACTOR,
        normalize_top_k_affinities=True, compute_dtype=jnp.bfloat16))
    assert out_bf16.shape == (S, B, H)
    assert jnp.allclose(out_bf16, ref, atol=5e-2, rtol=5e-2), "bf16 Pallas output mismatch"

    print("KERNEL_OK")
</pallas_src>

<mosaic_0001>
module attributes {stable_mosaic.version = 11 : i64} {
  func.func @_moe_expert_kernel(%arg0: i32, %arg1: i32, %arg2: i32, %arg3: memref<128x32xf32, #tpu.memory_space<vmem>>, %arg4: memref<1x1x128xi32, #tpu.memory_space<vmem>>, %arg5: memref<1x128x1xi32, #tpu.memory_space<vmem>>, %arg6: memref<1x128x1xf32, #tpu.memory_space<vmem>>, %arg7: memref<1x32x64xf32, #tpu.memory_space<vmem>>, %arg8: memref<1x32x64xf32, #tpu.memory_space<vmem>>, %arg9: memref<1x64x32xf32, #tpu.memory_space<vmem>>, %arg10: memref<128x32xf32, #tpu.memory_space<vmem>>, %arg11: memref<128x32xf32, #tpu.memory_space<vmem>>, %arg12: memref<128x32xf32, #tpu.memory_space<vmem>>, %arg13: memref<128x32xf32, #tpu.memory_space<vmem>>) attributes {dimension_semantics = [#tpu.dimension_semantics<parallel>, #tpu.dimension_semantics<arbitrary>, #tpu.dimension_semantics<arbitrary>], iteration_bounds = array<i64: 1, 8, 1>, scalar_prefetch = 0 : i64, scratch_operands = 3 : i64, tpu.core_type = #tpu.core_type<tc>, window_params = [{transform_indices = @transform_0, window_bounds = array<i64: 128, 32>}, {transform_indices = @transform_1, window_bounds = array<i64: 1, 1, 128>}, {transform_indices = @transform_2, window_bounds = array<i64: 1, 128, 1>}, {transform_indices = @transform_3, window_bounds = array<i64: 1, 128, 1>}, {transform_indices = @transform_4, window_bounds = array<i64: 1, 32, 64>}, {transform_indices = @transform_5, window_bounds = array<i64: 1, 32, 64>}, {transform_indices = @transform_6, window_bounds = array<i64: 1, 64, 32>}, {transform_indices = @transform_7, window_bounds = array<i64: 128, 32>}]} {
    %c0_i32 = arith.constant 0 : i32
    %0 = arith.cmpi eq, %arg1, %c0_i32 : i32
    %c0_i32_0 = arith.constant 0 : i32
    %1 = arith.cmpi eq, %arg2, %c0_i32_0 : i32
    %2 = arith.andi %0, %1 : i1
    %3 = arith.extui %2 : i1 to i32
    %c0_i32_1 = arith.constant 0 : i32
    %4 = arith.cmpi ne, %3, %c0_i32_1 : i32
    scf.if %4 {
      %cst_25 = arith.constant 0.000000e+00 : f32
      %36 = vector.broadcast %cst_25 : f32 to vector<128x32xf32>
      %c0_26 = arith.constant 0 : index
      %c0_27 = arith.constant 0 : index
      %37 = vector.load %arg11[%c0_26, %c0_27] : memref<128x32xf32, #tpu.memory_space<vmem>>, vector<128x32xf32>
      tpu.vector_store %arg11[%c0_26, %c0_27], %36 {strides = array<i32>} : memref<128x32xf32, #tpu.memory_space<vmem>>, vector<128x32xf32>,
    } else {
    }
    %c0_i32_2 = arith.constant 0 : i32
    %5 = arith.cmpi eq, %arg2, %c0_i32_2 : i32
    %6 = arith.extui %5 : i1 to i32
    %c0_i32_3 = arith.constant 0 : i32
    %7 = arith.cmpi ne, %6, %c0_i32_3 : i32
    scf.if %7 {
      %c0_25 = arith.constant 0 : index
      %c0_26 = arith.constant 0 : index
      %c0_27 = arith.constant 0 : index
      %36 = vector.load %arg4[%c0_25, %c0_26, %c0_27] : memref<1x1x128xi32, #tpu.memory_space<vmem>>, vector<1x1x128xi32>
      %37 = vector.shape_cast %36 : vector<1x1x128xi32> to vector<1x128xi32>
      %38 = tpu.iota {dimensions = array<i32: 0>} : vector<128x128xi32>
      %c1_i32 = arith.constant 1 : i32
      %39 = vector.broadcast %c1_i32 : i32 to vector<128x128xi32>
      %40 = arith.addi %38, %39 : vector<128x128xi32>
      %41 = vector.broadcast %37 : vector<1x128xi32> to vector<128x128xi32>
      %42 = arith.cmpi eq, %41, %40 : vector<128x128xi32>
      %43 = arith.extui %42 : vector<128x128xi1> to vector<128x128xi32>
      %44 = arith.sitofp %43 : vector<128x128xi32> to vector<128x128xf32>
      %c0_28 = arith.constant 0 : index
      %c0_29 = arith.constant 0 : index
      %45 = vector.load %arg3[%c0_28, %c0_29] : memref<128x32xf32, #tpu.memory_space<vmem>>, vector<128x32xf32>
      %cst_30 = arith.constant dense<0.000000e+00> : vector<128x32xf32>
      %46 = tpu.matmul %44, %45, %cst_30 {dimension_numbers = #tpu.dot_dimension_numbers<[1], [0], [0], [1], [0, 0, 1, 1], [], []>} : vector<128x128xf32>, vector<128x32xf32>, vector<128x32xf32> -> vector<128x32xf32>
      %c0_31 = arith.constant 0 : index
      %c0_32 = arith.constant 0 : index
      %47 = vector.load %arg12[%c0_31, %c0_32] : memref<128x32xf32, #tpu.memory_space<vmem>>, vector<128x32xf32>
      tpu.vector_store %arg12[%c0_31, %c0_32], %46 {strides = array<i32>} : memref<128x32xf32, #tpu.memory_space<vmem>>, vector<128x32xf32>,
      %cst_33 = arith.constant 0.000000e+00 : f32
      %48 = vector.broadcast %cst_33 : f32 to vector<128x32xf32>
      %c0_34 = arith.constant 0 : index
      %c0_35 = arith.constant 0 : index
      %49 = vector.load %arg13[%c0_34, %c0_35] : memref<128x32xf32, #tpu.memory_space<vmem>>, vector<128x32xf32>
      tpu.vector_store %arg13[%c0_34, %c0_35], %48 {strides = array<i32>} : memref<128x32xf32, #tpu.memory_space<vmem>>, vector<128x32xf32>,
    } else {
    }
    %c0 = arith.constant 0 : index
    %c0_4 = arith.constant 0 : index
    %8 = vector.load %arg12[%c0, %c0_4] : memref<128x32xf32, #tpu.memory_space<vmem>>, vector<128x32xf32>
    %c0_5 = arith.constant 0 : index
    %c0_6 = arith.constant 0 : index
    %c0_7 = arith.constant 0 : index
    %9 = vector.load %arg7[%c0_5, %c0_6, %c0_7] : memref<1x32x64xf32, #tpu.memory_space<vmem>>, vector<1x32x64xf32>
    %10 = vector.shape_cast %9 : vector<1x32x64xf32> to vector<32x64xf32>
    %cst = arith.constant dense<0.000000e+00> : vector<128x64xf32>
    %11 = tpu.matmul %8, %10, %cst {dimension_numbers = #tpu.dot_dimension_numbers<[1], [0], [0], [1], [0, 0, 1, 1], [], []>} : vector<128x32xf32>, vector<32x64xf32>, vector<128x64xf32> -> vector<128x64xf32>
    %c0_8 = arith.constant 0 : index
    %c0_9 = arith.constant 0 : index
    %c0_10 = arith.constant 0 : index
    %12 = vector.load %arg8[%c0_8, %c0_9, %c0_10] : memref<1x32x64xf32, #tpu.memory_space<vmem>>, vector<1x32x64xf32>
    %13 = vector.shape_cast %12 : vector<1x32x64xf32> to vector<32x64xf32>
    %cst_11 = arith.constant dense<0.000000e+00> : vector<128x64xf32>
    %14 = tpu.matmul %8, %13, %cst_11 {dimension_numbers = #tpu.dot_dimension_numbers<[1], [0], [0], [1], [0, 0, 1, 1], [], []>} : vector<128x32xf32>, vector<32x64xf32>, vector<128x64xf32> -> vector<128x64xf32>
    %15 = arith.negf %11 : vector<128x64xf32>
    %16 = math.exp %15 : vector<128x64xf32>
    %cst_12 = arith.constant 1.000000e+00 : f32
    %17 = vector.broadcast %cst_12 : f32 to vector<128x64xf32>
    %18 = arith.addf %17, %16 : vector<128x64xf32>
    %19 = arith.divf %17, %18 : vector<128x64xf32>
    %20 = arith.mulf %11, %19 : vector<128x64xf32>
    %21 = arith.mulf %20, %14 : vector<128x64xf32>
    %c0_13 = arith.constant 0 : index
    %c0_14 = arith.constant 0 : index
    %22 = vector.load %arg13[%c0_13, %c0_14] : memref<128x32xf32, #tpu.memory_space<vmem>>, vector<128x32xf32>
    %c0_15 = arith.constant 0 : index
    %c0_16 = arith.constant 0 : index
    %c0_17 = arith.constant 0 : index
    %23 = vector.load %arg9[%c0_15, %c0_16, %c0_17] : memref<1x64x32xf32, #tpu.memory_space<vmem>>, vector<1x64x32xf32>
    %24 = vector.shape_cast %23 : vector<1x64x32xf32> to vector<64x32xf32>
    %cst_18 = arith.constant dense<0.000000e+00> : vector<128x32xf32>
    %25 = tpu.matmul %21, %24, %cst_18 {dimension_numbers = #tpu.dot_dimension_numbers<[1], [0], [0], [1], [0, 0, 1, 1], [], []>} : vector<128x64xf32>, vector<64x32xf32>, vector<128x32xf32> -> vector<128x32xf32>
    %26 = arith.addf %22, %25 : vector<128x32xf32>
    %c0_19 = arith.constant 0 : index
    %c0_20 = arith.constant 0 : index
    %27 = vector.load %arg13[%c0_19, %c0_20] : memref<128x32xf32, #tpu.memory_space<vmem>>, vector<128x32xf32>
    tpu.vector_store %arg13[%c0_19, %c0_20], %26 {strides = array<i32>} : memref<128x32xf32, #tpu.memory_space<vmem>>, vector<128x32xf32>,
    %c0_i32_21 = arith.constant 0 : i32
    %28 = arith.cmpi eq, %arg2, %c0_i32_21 : i32
    %29 = arith.extui %28 : i1 to i32
    %c0_i32_22 = arith.constant 0 : i32
    %30 = arith.cmpi ne, %29, %c0_i32_22 : i32
    scf.if %30 {
      %c0_25 = arith.constant 0 : index
      %c0_26 = arith.constant 0 : index
      %c0_27 = arith.constant 0 : index
      %36 = vector.load %arg5[%c0_25, %c0_26, %c0_27] : memref<1x128x1xi32, #tpu.memory_space<vmem>>, vector<1x128x1xi32>
      %37 = vector.shape_cast %36 : vector<1x128x1xi32> to vector<128x1xi32>
      %38 = tpu.iota {dimensions = array<i32: 1>} : vector<128x128xi32>
      %c1_i32 = arith.constant 1 : i32
      %39 = vector.broadcast %c1_i32 : i32 to vector<128x128xi32>
      %40 = arith.addi %38, %39 : vector<128x128xi32>
      %41 = vector.broadcast %37 : vector<128x1xi32> to vector<128x128xi32>
      %42 = arith.cmpi eq, %41, %40 : vector<128x128xi32>
      %43 = arith.extui %42 : vector<128x128xi1> to vector<128x128xi32>
      %44 = arith.sitofp %43 : vector<128x128xi32> to vector<128x128xf32>
      %c0_28 = arith.constant 0 : index
      %c0_29 = arith.constant 0 : index
      %c0_30 = arith.constant 0 : index
      %45 = vector.load %arg6[%c0_28, %c0_29, %c0_30] : memref<1x128x1xf32, #tpu.memory_space<vmem>>, vector<1x128x1xf32>
      %46 = vector.shape_cast %45 : vector<1x128x1xf32> to vector<128x1xf32>
      %47 = vector.broadcast %46 : vector<128x1xf32> to vector<128x128xf32>
      %48 = arith.mulf %44, %47 : vector<128x128xf32>
      %c0_31 = arith.constant 0 : index
      %c0_32 = arith.constant 0 : index
      %49 = vector.load %arg11[%c0_31, %c0_32] : memref<128x32xf32, #tpu.memory_space<vmem>>, vector<128x32xf32>
      %c0_33 = arith.constant 0 : index
      %c0_34 = arith.constant 0 : index
      %50 = vector.load %arg13[%c0_33, %c0_34] : memref<128x32xf32, #tpu.memory_space<vmem>>, vector<128x32xf32>
      %cst_35 = arith.constant dense<0.000000e+00> : vector<128x32xf32>
      %51 = tpu.matmul %48, %50, %cst_35 {dimension_numbers = #tpu.dot_dimension_numbers<[1], [0], [0], [1], [0, 0, 1, 1], [], []>} : vector<128x128xf32>, vector<128x32xf32>, vector<128x32xf32> -> vector<128x32xf32>
      %52 = arith.addf %49, %51 : vector<128x32xf32>
      %c0_36 = arith.constant 0 : index
      %c0_37 = arith.constant 0 : index
      %53 = vector.load %arg11[%c0_36, %c0_37] : memref<128x32xf32, #tpu.memory_space<vmem>>, vector<128x32xf32>
      tpu.vector_store %arg11[%c0_36, %c0_37], %52 {strides = array<i32>} : memref<128x32xf32, #tpu.memory_space<vmem>>, vector<128x32xf32>,
    } else {
    }
    %c7_i32 = arith.constant 7 : i32
    %31 = arith.cmpi eq, %arg1, %c7_i32 : i32
    %c0_i32_23 = arith.constant 0 : i32
    %32 = arith.cmpi eq, %arg2, %c0_i32_23 : i32
    %33 = arith.andi %31, %32 : i1
    %34 = arith.extui %33 : i1 to i32
    %c0_i32_24 = arith.constant 0 : i32
    %35 = arith.cmpi ne, %34, %c0_i32_24 : i32
    scf.if %35 {
      %c0_25 = arith.constant 0 : index
      %c0_26 = arith.constant 0 : index
      %36 = vector.load %arg11[%c0_25, %c0_26] : memref<128x32xf32, #tpu.memory_space<vmem>>, vector<128x32xf32>
      %c0_27 = arith.constant 0 : index
      %c0_28 = arith.constant 0 : index
      %37 = vector.load %arg10[%c0_27, %c0_28] : memref<128x32xf32, #tpu.memory_space<vmem>>, vector<128x32xf32>
      tpu.vector_store %arg10[%c0_27, %c0_28], %36 {strides = array<i32>} : memref<128x32xf32, #tpu.memory_space<vmem>>, vector<128x32xf32>,
    } else {
    }
    return
  }
  func.func @transform_0(%arg0: i32, %arg1: i32, %arg2: i32) -> (i32, i32) {
    %c0_i32 = arith.constant 0 : i32
    %c0_i32_0 = arith.constant 0 : i32
    return %arg0, %c0_i32 : i32, i32
  }
  func.func @transform_1(%arg0: i32, %arg1: i32, %arg2: i32) -> (i32, i32, i32) {
    %c0_i32 = arith.constant 0 : i32
    %c0_i32_0 = arith.constant 0 : i32
    return %arg1, %c0_i32, %arg0 : i32, i32, i32
  }
  func.func @transform_2(%arg0: i32, %arg1: i32, %arg2: i32) -> (i32, i32, i32) {
    %c0_i32 = arith.constant 0 : i32
    %c0_i32_0 = arith.constant 0 : i32
    return %arg1, %arg0, %c0_i32 : i32, i32, i32
  }
  func.func @transform_3(%arg0: i32, %arg1: i32, %arg2: i32) -> (i32, i32, i32) {
    %c0_i32 = arith.constant 0 : i32
    %c0_i32_0 = arith.constant 0 : i32
    return %arg1, %arg0, %c0_i32 : i32, i32, i32
  }
  func.func @transform_4(%arg0: i32, %arg1: i32, %arg2: i32) -> (i32, i32, i32) {
    %c0_i32 = arith.constant 0 : i32
    %c0_i32_0 = arith.constant 0 : i32
    return %arg1, %c0_i32, %arg2 : i32, i32, i32
  }
  func.func @transform_5(%arg0: i32, %arg1: i32, %arg2: i32) -> (i32, i32, i32) {
    %c0_i32 = arith.constant 0 : i32
    %c0_i32_0 = arith.constant 0 : i32
    return %arg1, %c0_i32, %arg2 : i32, i32, i32
  }
  func.func @transform_6(%arg0: i32, %arg1: i32, %arg2: i32) -> (i32, i32, i32) {
    %c0_i32 = arith.constant 0 : i32
    %c0_i32_0 = arith.constant 0 : i32
    return %arg1, %arg2, %c0_i32 : i32, i32, i32
  }
  func.func @transform_7(%arg0: i32, %arg1: i32, %arg2: i32) -> (i32, i32) {
    %c0_i32 = arith.constant 0 : i32
    %c0_i32_0 = arith.constant 0 : i32
    return %arg0, %c0_i32 : i32, i32
  }
}

</mosaic_0001>

<bundles_post_ra>
// kernel: tpu_custom_call.1
= control target key start
LH: loop header
LB: loop body
LE: loop exit
PB: predicated region body
PF: predicated region fallthrough
CT: control target
= control target key end

     0   :  { %s2310_s24 = smov 0   ;;  %s2312_s25 = smov 0   ;;  %s3091_s0 = inlined_call_operand.vmem [shape: f32[128,32], index: 0, kind: input, shape index: {}]   ;;  %s3092_s1 = inlined_call_operand.vmem [shape: s32[8,1,128], index: 1, kind: input, shape index: {}]   ;;  %s3093_s2 = inlined_call_operand.vmem [shape: s32[8,128,1], index: 2, kind: input, shape index: {}]   ;;  %s3094_s3 = inlined_call_operand.vmem [shape: f32[8,128,1], index: 3, kind: input, shape index: {}]   ;;  %s3095_s4 = inlined_call_operand.vmem [shape: f32[8,32,64], index: 4, kind: input, shape index: {}]   ;;  %s3096_s5 = inlined_call_operand.vmem [shape: f32[8,32,64], index: 5, kind: input, shape index: {}]   ;;  %s3097_s6 = inlined_call_operand.vmem [shape: f32[8,64,32], index: 6, kind: input, shape index: {}]   ;;  %s3098_s7 = inlined_call_operand.vmem [shape: f32[128,32], index: 7, kind: output, shape index: {}]  }
   0x1   :  { %s2314_s26 = smov 0  }
   0x2 LB: > { %s32_s27 = sadd.s32 1, %s2260_s25  ;;  %p1998_p0 = scmp.ge.s32.totalorder %s2264_s26, 1  ;;  %s2264_s26 = sphi %s2314_s26, %s17_s26   ;;  %s2260_s25 = sphi %s2312_s25, %s3114_s25   ;;  %s2256_s24 = sphi %s2310_s24, %s3113_s24  }
   0x3   : > { %p34_p1 = scmp.ge.s32.totalorder %s32_s27, 8  ;;  %p351_p2 = scmp.lt.s32.totalorder %s2264_s26, 9 }
   0x5   : > { %s3116_s27 = smov (%p34_p1, %s32_s27), 0  ;;  %p352_p3 = pnand %p1998_p0, %p351_p2 }
   0x6   : > { %p438_p4 = scmp.lt.s32.totalorder (!%p352_p3), %s2256_s24, 7  ;;  %p496_p5 = scmp.eq.s32.totalorder (!%p352_p3), %s2256_s24, 0 }
   0x7   : > { %355 = sbr.rel (%p352_p3) target bundleno = 967 (0x3c7), region = 48 }
   0xc   : > { %s2333_s28 = scalar_select %p438_p4, %s2256_s24, 7  ;;  %vm502_vm0 = vcmask (%p496_p5), 261120   ;;  %v2266_v0 = vmov (%p496_p5), 0.0  }
   0xd   : > { %503 = vst.msk [vmem:[#allocation2] sm:$0xff] (%p496_p5), %vm502_vm0, %v2266_v0 }
   0xe   : > { %s443_s8 = scalar_lea.vmem %s3092_s1, %s2333_s28  ;;  %s2127_s9 = sshll.u32 %s2333_s28, 7  ;;  %504 = vst.msk [vmem:[#allocation2 + $0x8] sm:$0xff] (%p496_p5), %vm502_vm0, %v2266_v0 }
   0xf   : > { %s2343_s12 = scalar_lea.vmem %s3093_s2, %s2127_s9  ;;  %s2348_s15 = scalar_lea.vmem %s3094_s3, %s2127_s9  ;;  %505 = vst.msk [vmem:[#allocation2 + $0x10] sm:$0xff] (%p496_p5), %vm502_vm0, %v2266_v0 }
  0x10   : > { %s2129_s16 = sshll.u32 %s2333_s28, 5  ;;  %s2131_s17 = sshll.u32 %s2333_s28, 6  ;;  %506 = vst.msk [vmem:[#allocation2 + $0x18] sm:$0xff] (%p496_p5), %vm502_vm0, %v2266_v0 }
  0x11   : > { %s2355_s20 = scalar_lea.vmem %s3095_s4, %s2129_s16  ;;  %s2360_s23 = scalar_lea.vmem %s3096_s5, %s2129_s16  ;;  %507 = vst.msk [vmem:[#allocation2 + $0x20] sm:$0xff] (%p496_p5), %vm502_vm0, %v2266_v0 }
  0x12   : > { %s2365_s10 = scalar_lea.vmem %s3097_s6, %s2131_s17  ;;  %501 = sbr.rel (!%p496_p5) target bundleno = 29 (0x1d), region = 52  ;;  %508 = vst.msk [vmem:[#allocation2 + $0x28] sm:$0xff] (%p496_p5), %vm502_vm0, %v2266_v0 }
  0x13   : > { %509 = vst.msk [vmem:[#allocation2 + $0x30] sm:$0xff] (%p496_p5), %vm502_vm0, %v2266_v0 }
  0x14   : > { %510 = vst.msk [vmem:[#allocation2 + $0x38] sm:$0xff] (%p496_p5), %vm502_vm0, %v2266_v0 }
  0x15   : > { %511 = vst.msk [vmem:[#allocation2 + $0x40] sm:$0xff] (%p496_p5), %vm502_vm0, %v2266_v0 }
  0x16   : > { %512 = vst.msk [vmem:[#allocation2 + $0x48] sm:$0xff] (%p496_p5), %vm502_vm0, %v2266_v0 }
  0x17   : > { %513 = vst.msk [vmem:[#allocation2 + $0x50] sm:$0xff] %vm502_vm0, %v2266_v0 }
  0x18   : > { %514 = vst.msk [vmem:[#allocation2 + $0x58] sm:$0xff] %vm502_vm0, %v2266_v0 }
  0x19   : > { %515 = vst.msk [vmem:[#allocation2 + $0x60] sm:$0xff] %vm502_vm0, %v2266_v0 }
  0x1a   : > { %516 = vst.msk [vmem:[#allocation2 + $0x68] sm:$0xff] %vm502_vm0, %v2266_v0 }
  0x1b   : > { %517 = vst.msk [vmem:[#allocation2 + $0x70] sm:$0xff] %vm502_vm0, %v2266_v0 }
  0x1c   : > { %518 = vst.msk [vmem:[#allocation2 + $0x78] sm:$0xff] %vm502_vm0, %v2266_v0 }
  0x1d PF: > { %v620_v1 = vld [vmem:[%s3091_s0 + $0x78] sm:$0xff]  ;;  %v619_v2 = vld [vmem:[%s3091_s0 + $0x70] sm:$0xff]  ;;  %v618_v3 = vld [vmem:[%s3091_s0 + $0x68] sm:$0xff]  ;;  %v523_v11 = vlaneseq  ;;  %v2267_v22 = vmov 1.0   ;;  %p1787_p6 = scmp.eq.s32.totalorder %s2256_s24, 7 }
  0x1e   : > { %621 = vmatpush.msra.mxu0 %v620_v1  ;;  %v617_v4 = vld [vmem:[%s3091_s0 + $0x60] sm:$0xff]  ;;  %v616_v5 = vld [vmem:[%s3091_s0 + $0x58] sm:$0xff]  ;;  %v615_v6 = vld [vmem:[%s3091_s0 + $0x50] sm:$0xff] }
  0x1f   : > { %v614_v7 = vld [vmem:[%s3091_s0 + $0x48] sm:$0xff]  ;;  %v613_v8 = vld [vmem:[%s3091_s0 + $0x40] sm:$0xff]  ;;  %v612_v9 = vld [vmem:[%s3091_s0 + $0x38] sm:$0xff]  ;;  %v2420_v14 = vshrl.u32 %v523_v11, 7 }
  0x20   : > { %622 = vmatpush.msra.mxu0 %v619_v2  ;;  %v611_v10 = vld [vmem:[%s3091_s0 + $0x30] sm:$0xff]  ;;  %v610_v12 = vld [vmem:[%s3091_s0 + $0x28] sm:$0xff]  ;;  %v609_v13 = vld [vmem:[%s3091_s0 + $0x20] sm:$0xff] }
  0x21   : > { %v608_v15 = vld [vmem:[%s3091_s0 + $0x18] sm:$0xff]  ;;  %v607_v16 = vld [vmem:[%s3091_s0 + $0x10] sm:$0xff]  ;;  %v540_v17 = vadd.s32 1, %v2420_v14  ;;  %v2434_v18 = vld [vmem:[%s443_s8] ss:$0 sm:$0xff]  ;;  %v525_v21 = vadd.s32 8, %v2420_v14 }
  0x22   : > { %623 = vmatpush.msra.mxu0 %v618_v3  ;;  %v606_v19 = vld [vmem:[%s3091_s0 + $0x8] sm:$0xff]  ;;  %v605_v20 = vld [vmem:[%s3091_s0] sm:$0xff]  ;;  %v526_v24 = vadd.s32 16, %v2420_v14  ;;  %v527_v26 = vadd.s32 24, %v2420_v14  ;;  %v528_v28 = vadd.s32 32, %v2420_v14  ;;  %v529_v30 = vadd.s32 40, %v2420_v14 }
  0x23   : > { %vm557_vm1 = vcmp.eq.s32.totalorder %v2434_v18, %v540_v17  ;;  %v541_v23 = vadd.s32 1, %v525_v21  ;;  %v530_v32 = vadd.s32 48, %v2420_v14  ;;  %v738_v33 = vld [vmem:[%s2355_s20 + $0x18] sm:$0xff]  ;;  %v531_v35 = vadd.s32 56, %v2420_v14  ;;  %v737_v42 = vld [vmem:[%s2355_s20 + $0x10] sm:$0xff]  ;;  %v736_v49 = vld [vmem:[%s2355_s20 + $0x8] sm:$0xff] }
  0x24   : > { %624 = vmatpush.msra.mxu0 %v617_v4  ;;  %v542_v25 = vadd.s32 1, %v526_v24  ;;  %v543_v27 = vadd.s32 1, %v527_v26  ;;  %v544_v29 = vadd.s32 1, %v528_v28  ;;  %v545_v31 = vadd.s32 1, %v529_v30  ;;  %2134 = vmatpush.msra.mxu1 %v738_v33  ;;  %v735_v51 = vld [vmem:[%s2355_s20] sm:$0xff]  ;;  %v856_v1 = vld [vmem:[%s2360_s23 + $0x18] sm:$0xff] }
  0x25   : > { %vm558_vm2 = vcmp.eq.s32.totalorder %v2434_v18, %v541_v23  ;;  %v546_v34 = vadd.s32 1, %v530_v32  ;;  %2135 = vmatpush.msra.mxu2 %v738_v33  ;;  %2136 = vmatpush.msra.mxu3 %v738_v33  ;;  %v547_v36 = vadd.s32 1, %v531_v35  ;;  %v532_v37 = vadd.s32 64, %v2420_v14  ;;  %v855_v4 = vld [vmem:[%s2360_s23 + $0x10] sm:$0xff]  ;;  %v1281_v32 = vld [vmem:[%s2365_s10 + $0x38] sm:$0xff] }
  0x26   : > { %625 = vmatpush.msra.mxu0 %v616_v5  ;;  %vm559_vm3 = vcmp.eq.s32.totalorder %v2434_v18, %v542_v25  ;;  %vm560_vm4 = vcmp.eq.s32.totalorder %v2434_v18, %v543_v27  ;;  %vm561_vm5 = vcmp.eq.s32.totalorder %v2434_v18, %v544_v29  ;;  %vm562_vm6 = vcmp.eq.s32.totalorder %v2434_v18, %v545_v31 }
  0x27   : > { %vm563_vm7 = vcmp.eq.s32.totalorder %v2434_v18, %v546_v34  ;;  %vm564_vm8 = vcmp.eq.s32.totalorder %v2434_v18, %v547_v36  ;;  %v548_v38 = vadd.s32 1, %v532_v37  ;;  %v533_v39 = vadd.s32 72, %v2420_v14  ;;  %2137 = vmatpush.msra.mxu1 %v737_v42  ;;  %2138 = vmatpush.msra.mxu2 %v737_v42  ;;  %v1280_v34 = vld [vmem:[%s2365_s10 + $0x30] sm:$0xff]  ;;  %v1279_v37 = vld [vmem:[%s2365_s10 + $0x28] sm:$0xff] }
  0x28   : > { %626 = vmatpush.msra.mxu0 %v615_v6  ;;  %v534_v41 = vadd.s32 80, %v2420_v14  ;;  %2139 = vmatpush.msra.mxu3 %v737_v42  ;;  %v535_v44 = vadd.s32 88, %v2420_v14  ;;  %v536_v46 = vadd.s32 96, %v2420_v14  ;;  %v537_v48 = vadd.s32 104, %v2420_v14 }
  0x29   : > { %vm565_vm9 = vcmp.eq.s32.totalorder %v2434_v18, %v548_v38  ;;  %v549_v40 = vadd.s32 1, %v533_v39  ;;  %2140 = vmatpush.msra.mxu1 %v736_v49  ;;  %2141 = vmatpush.msra.mxu2 %v736_v49  ;;  %v538_v52 = vadd.s32 112, %v2420_v14  ;;  %v539_v54 = vadd.s32 120, %v2420_v14  ;;  %v1278_v39 = vld [vmem:[%s2365_s10 + $0x20] sm:$0xff] }
  0x2a   : > { %627 = vmatpush.msra.mxu0 %v614_v7  ;;  %v550_v43 = vadd.s32 1, %v534_v41  ;;  %v551_v45 = vadd.s32 1, %v535_v44  ;;  %v552_v47 = vadd.s32 1, %v536_v46  ;;  %v553_v50 = vadd.s32 1, %v537_v48  ;;  %2142 = vmatpush.msra.mxu3 %v736_v49  ;;  %v854_v7 = vld [vmem:[%s2360_s23 + $0x8] sm:$0xff]  ;;  %v1277_v41 = vld [vmem:[%s2365_s10 + $0x18] sm:$0xff] }
  0x2b   : > { %vm566_vm10 = vcmp.eq.s32.totalorder %v2434_v18, %v549_v40  ;;  %2143 = vmatpush.msra.mxu1 %v735_v51  ;;  %2144 = vmatpush.msra.mxu2 %v735_v51  ;;  %v554_v53 = vadd.s32 1, %v538_v52  ;;  %v555_v55 = vadd.s32 1, %v539_v54  ;;  %v1275_v46 = vld [vmem:[%s2365_s10 + $0x8] sm:$0xff]  ;;  %v1274_v48 = vld [vmem:[%s2365_s10] sm:$0xff] }
  0x2c   : > { %628 = vmatpush.msra.mxu0 %v613_v8  ;;  %vm567_vm11 = vcmp.eq.s32.totalorder %v2434_v18, %v550_v43  ;;  %vm568_vm12 = vcmp.eq.s32.totalorder %v2434_v18, %v551_v45  ;;  %vm569_vm13 = vcmp.eq.s32.totalorder %v2434_v18, %v552_v47  ;;  %vm570_vm14 = vcmp.eq.s32.totalorder %v2434_v18, %v553_v50 }
  0x2d   : > { %2145 = vmatpush.msra.mxu3 %v735_v51  ;;  %vm571_vm15 = vcmp.eq.s32.totalorder %v2434_v18, %v554_v53  ;;  %vm572_vm0 = vcmp.eq.s32.totalorder %v2434_v18, %v555_v55  ;;  %869 = vmatpush.msrb.mxu2 %v856_v1 }
  0x2e   : > { %629 = vmatpush.msra.mxu0 %v612_v9 }
  0x2f   : > { %870 = vmatpush.msrb.mxu2 %v855_v4  ;;  %1339 = vmatpush.msrb.mxu3 %v1281_v32 }
  0x30   : > { %630 = vmatpush.msra.mxu0 %v611_v10  ;;  %v853_v10 = vld [vmem:[%s2360_s23] sm:$0xff] }
  0x31   : > { %871 = vmatpush.msrb.mxu2 %v854_v7  ;;  %1340 = vmatpush.msrb.mxu3 %v1280_v34 }
  0x32   : > { %631 = vmatpush.msra.mxu0 %v610_v12 }
  0x33   : > { %872 = vmatpush.msrb.mxu2 %v853_v10  ;;  %1341 = vmatpush.msrb.mxu3 %v1279_v37 }
  0x34   : > { %632 = vmatpush.msra.mxu0 %v609_v13 }
  0x35   : > { %1342 = vmatpush.msrb.mxu3 %v1278_v39 }
  0x36   : > { %633 = vmatpush.msra.mxu0 %v608_v15 }
  0x37   : > { %1343 = vmatpush.msrb.mxu3 %v1277_v41 }
  0x38   : > { %634 = vmatpush.msra.mxu0 %v607_v16 }
  0x3a   : > { %635 = vmatpush.msra.mxu0 %v606_v19 }
  0x3c   : > { %636 = vmatpush.msra.mxu0 %v605_v20 }
  0x3d   : > { %2026 = vmatmul.msk.f32.vlgmr.msra.gmra.mxu0 %vm557_vm1, %v2267_v22  ;;  %vm686_vm1 = vcmask 261120  }
  0x3e   : > { %800 = vmatpush.msrb.mxu0 %v738_v33 }
  0x40   : > { %801 = vmatpush.msrb.mxu0 %v737_v42  ;;  %v1276_v42 = vld [vmem:[%s2365_s10 + $0x10] sm:$0xff] }
  0x41   : > { %1344 = vmatpush.msrb.mxu3 %v1276_v42 }
  0x42   : > { %802 = vmatpush.msrb.mxu0 %v736_v49 }
  0x43   : > { %1345 = vmatpush.msrb.mxu3 %v1275_v46 }
  0x44   : > { %803 = vmatpush.msrb.mxu0 %v735_v51 }
  0x45   : > { %2027 = vmatmul.msk.f32.gmra.mxu0 %vm558_vm2, %v2267_v22  ;;  %1346 = vmatpush.msrb.mxu3 %v1274_v48 }
  0x4d   : > { %2028 = vmatmul.msk.f32.gmra.mxu0 %vm559_vm3, %v2267_v22 }
  0x55   : > { %2029 = vmatmul.msk.f32.gmra.mxu0 %vm560_vm4, %v2267_v22 }
  0x5d   : > { %2030 = vmatmul.msk.f32.gmra.mxu0 %vm561_vm5, %v2267_v22 }
  0x65   : > { %2031 = vmatmul.msk.f32.gmra.mxu0 %vm562_vm6, %v2267_v22 }
  0x6d   : > { %2032 = vmatmul.msk.f32.gmra.mxu0 %vm563_vm7, %v2267_v22 }
  0x75   : > { %2033 = vmatmul.msk.f32.gmra.mxu0 %vm564_vm8, %v2267_v22 }
  0x7d   : > { %2034 = vmatmul.msk.f32.gmra.mxu0 %vm565_vm9, %v2267_v22  ;;  %vm1282_vm9 = vcmask 523264  }
  0x85   : > { %2035 = vmatmul.msk.f32.gmra.mxu0 %vm566_vm10, %v2267_v22 }
  0x8d   : > { %2036 = vmatmul.msk.f32.gmra.mxu0 %vm567_vm11, %v2267_v22 }
  0x95   : > { %2037 = vmatmul.msk.f32.gmra.mxu0 %vm568_vm12, %v2267_v22 }
  0x9d   : > { %2038 = vmatmul.msk.f32.gmra.mxu0 %vm569_vm13, %v2267_v22 }
  0xa5   : > { %2039 = vmatmul.msk.f32.gmra.mxu0 %vm570_vm14, %v2267_v22 }
  0xad   : > { %2040 = vmatmul.msk.f32.gmra.mxu0 %vm571_vm15, %v2267_v22 }
  0xb5   : > { %2041 = vmatmul.msk.f32.gmra.mxu0 %vm572_vm0, %v2267_v22 }
  0xba   : > { %v638_v56 = vpop.f32.mrf.mxu0 }
  0xbb   : > { %687 = vst.msk [vmem:[#allocation3] sm:$0xff] %vm686_vm1, %v638_v56 }
  0xc2   : > { %v641_v57 = vpop.f32.mrf.mxu0  ;;  %v719_v58 = vld [vmem:[#allocation3] sm:$0xff] }
  0xc3   : > { %688 = vst.msk [vmem:[#allocation3 + $0x8] sm:$0xff] %vm686_vm1, %v641_v57  ;;  %2042 = vmatmul.msk.f32.vlgmr.msrb.gmra.mxu0 %vm686_vm1, %v719_v58 }
  0xca   : > { %v644_v59 = vpop.f32.mrf.mxu0  ;;  %v720_v60 = vld [vmem:[#allocation3 + $0x8] sm:$0xff] }
  0xcb   : > { %689 = vst.msk [vmem:[#allocation3 + $0x10] sm:$0xff] %vm686_vm1, %v644_v59  ;;  %2043 = vmatmul.msk.f32.vlgmr.msra.gmra.mxu1 %vm686_vm1, %v720_v60 }
  0xd2   : > { %v647_v61 = vpop.f32.mrf.mxu0  ;;  %v721_v62 = vld [vmem:[#allocation3 + $0x10] sm:$0xff] }
  0xd3   : > { %690 = vst.msk [vmem:[#allocation3 + $0x18] sm:$0xff] %vm686_vm1, %v647_v61  ;;  %2044 = vmatmul.msk.f32.gmra.mxu1 %vm686_vm1, %v721_v62 }
  0xda   : > { %v650_v63 = vpop.f32.mrf.mxu0  ;;  %v722_v0 = vld [vmem:[#allocation3 + $0x18] sm:$0xff] }
  0xdb   : > { %691 = vst.msk [vmem:[#allocation3 + $0x20] sm:$0xff] %vm686_vm1, %v650_v63  ;;  %2045 = vmatmul.msk.f32.gmra.mxu1 %vm686_vm1, %v722_v0 }
  0xe2   : > { %v653_v2 = vpop.f32.mrf.mxu0  ;;  %v723_v3 = vld [vmem:[#allocation3 + $0x20] sm:$0xff] }
  0xe3   : > { %692 = vst.msk [vmem:[#allocation3 + $0x28] sm:$0xff] %vm686_vm1, %v653_v2  ;;  %2046 = vmatmul.msk.f32.gmra.mxu1 %vm686_vm1, %v723_v3 }
  0xea   : > { %v656_v5 = vpop.f32.mrf.mxu0  ;;  %v724_v6 = vld [vmem:[#allocation3 + $0x28] sm:$0xff] }
  0xeb   : > { %693 = vst.msk [vmem:[#allocation3 + $0x30] sm:$0xff] %vm686_vm1, %v656_v5  ;;  %2047 = vmatmul.msk.f32.gmra.mxu1 %vm686_vm1, %v724_v6 }
  0xf2   : > { %v659_v8 = vpop.f32.mrf.mxu0  ;;  %v725_v9 = vld [vmem:[#allocation3 + $0x30] sm:$0xff] }
  0xf3   : > { %694 = vst.msk [vmem:[#allocation3 + $0x38] sm:$0xff] %vm686_vm1, %v659_v8  ;;  %2048 = vmatmul.msk.f32.vlgmr.msra.gmra.mxu2 %vm686_vm1, %v725_v9 }
  0xfa   : > { %v662_v12 = vpop.f32.mrf.mxu0  ;;  %v726_v13 = vld [vmem:[#allocation3 + $0x38] sm:$0xff] }
  0xfb   : > { %695 = vst.msk [vmem:[#allocation3 + $0x40] sm:$0xff] %vm686_vm1, %v662_v12  ;;  %2049 = vmatmul.msk.f32.gmra.mxu2 %vm686_vm1, %v726_v13 }
 0x102   : > { %v665_v14 = vpop.f32.mrf.mxu0  ;;  %v727_v15 = vld [vmem:[#allocation3 + $0x40] sm:$0xff] }
 0x103   : > { %696 = vst.msk [vmem:[#allocation3 + $0x48] sm:$0xff] %vm686_vm1, %v665_v14  ;;  %2050 = vmatmul.msk.f32.gmra.mxu2 %vm686_vm1, %v727_v15 }
 0x10a   : > { %v668_v16 = vpop.f32.mrf.mxu0  ;;  %v728_v17 = vld [vmem:[#allocation3 + $0x48] sm:$0xff] }
 0x10b   : > { %697 = vst.msk [vmem:[#allocation3 + $0x50] sm:$0xff] %vm686_vm1, %v668_v16  ;;  %2051 = vmatmul.msk.f32.gmra.mxu2 %vm686_vm1, %v728_v17 }
 0x112   : > { %v729_v18 = vld [vmem:[#allocation3 + $0x50] sm:$0xff]  ;;  %v671_v19 = vpop.f32.mrf.mxu0 }
 0x113   : > { %2052 = vmatmul.msk.f32.gmra.mxu2 %vm686_vm1, %v729_v18  ;;  %698 = vst.msk [vmem:[#allocation3 + $0x58] sm:$0xff] %vm686_vm1, %v671_v19 }
 0x11a   : > { %v674_v20 = vpop.f32.mrf.mxu0  ;;  %v730_v21 = vld [vmem:[#allocation3 + $0x58] sm:$0xff] }
 0x11b   : > { %2058 = vmatmul.msk.f32.vlgmr.msrb.gmra.mxu2 %vm686_vm1, %v719_v58  ;;  %699 = vst.msk [vmem:[#allocation3 + $0x60] sm:$0xff] %vm686_vm1, %v674_v20  ;;  %2053 = vmatmul.msk.f32.vlgmr.msra.gmra.mxu3 %vm686_vm1, %v730_v21 }
 0x122   : > { %v677_v22 = vpop.f32.mrf.mxu0  ;;  %v731_v23 = vld [vmem:[#allocation3 + $0x60] sm:$0xff] }
 0x123   : > { %2059 = vmatmul.msk.f32.gmra.mxu2 %vm686_vm1, %v720_v60  ;;  %700 = vst.msk [vmem:[#allocation3 + $0x68] sm:$0xff] %vm686_vm1, %v677_v22  ;;  %2054 = vmatmul.msk.f32.gmra.mxu3 %vm686_vm1, %v731_v23 }
 0x12a   : > { %v680_v24 = vpop.f32.mrf.mxu0  ;;  %v732_v25 = vld [vmem:[#allocation3 + $0x68] sm:$0xff] }
 0x12b   : > { %2060 = vmatmul.msk.f32.gmra.mxu2 %vm686_vm1, %v721_v62  ;;  %701 = vst.msk [vmem:[#allocation3 + $0x70] sm:$0xff] %vm686_vm1, %v680_v24  ;;  %2055 = vmatmul.msk.f32.gmra.mxu3 %vm686_vm1, %v732_v25 }
 0x132   : > { %v683_v26 = vpop.f32.mrf.mxu0  ;;  %v733_v27 = vld [vmem:[#allocation3 + $0x70] sm:$0xff] }
 0x133   : > { %2061 = vmatmul.msk.f32.gmra.mxu2 %vm686_vm1, %v722_v0  ;;  %702 = vst.msk [vmem:[#allocation3 + $0x78] sm:$0xff] %vm686_vm1, %v683_v26  ;;  %2056 = vmatmul.msk.f32.gmra.mxu3 %vm686_vm1, %v733_v27 }
 0x13a   : > { %v2532_v28 = vld [vmem:[#allocation3 + $0x78] sm:$0xff] }
 0x13b   : > { %2062 = vmatmul.msk.f32.gmra.mxu2 %vm686_vm1, %v723_v3  ;;  %2057 = vmatmul.msk.f32.gmra.mxu3 %vm686_vm1, %v2532_v28 }
 0x140   : > { %v2542_v29 = vpop.f32.mrf.mxu0 }
 0x141   : > { %v2074_v31 = vmul.f32 -1.442695, %v2542_v29 }
 0x143   : > { %2063 = vmatmul.msk.f32.gmra.mxu2 %vm686_vm1, %v724_v6  ;;  %2178 = vpow2.f32 %v2074_v31 }
 0x148   : > { %v2544_v30 = vpop.f32.mrf.mxu1 }
 0x149   : > { %v2075_v35 = vmul.f32 -1.442695, %v2544_v30  ;;  %v2179_v38 = vpop.eup %2178 }
 0x14a   : > { %v970_v40 = vadd.f32 1.0, %v2179_v38 }
 0x14b   : > { %2064 = vmatmul.msk.f32.gmra.mxu2 %vm686_vm1, %v725_v9  ;;  %2180 = vpow2.f32 %v2075_v35 }
 0x14c   : > { %2182 = vrcp.f32 %v970_v40  ;;  %v997_v5 = vand.u32 2147483648, %v970_v40  ;;  %vm991_vm3 = vweird.f32 %v970_v40  ;;  %v995_v6 = vand.u32 2147483647, %v970_v40 }
 0x14e   : > { %v998_v14 = vor.u32 1.1754944e-38, %v997_v5  ;;  %vm996_vm5 = vcmp.eq.f32.partialorder %v995_v6, 8.507059e+37 }
 0x150   : > { %v2550_v33 = vpop.f32.mrf.mxu1 }
 0x151   : > { %v2076_v43 = vmul.f32 -1.442695, %v2550_v33  ;;  %v2181_v47 = vpop.eup %2180 }
 0x152   : > { %v2568_v49 = vadd.f32 1.0, %v2181_v47  ;;  %v2183_v50 = vpop.eup %2182 }
 0x153   : > { %2065 = vmatmul.msk.f32.gmra.mxu2 %vm686_vm1, %v726_v13  ;;  %2184 = vpow2.f32 %v2076_v43  ;;  %v987_v54 = vmul.f32 %v2183_v50, %v970_v40  ;;  %vm992_vm2 = vweird.f32 %v2183_v50 }
 0x154   : > { %2186 = vrcp.f32 %v2568_v49  ;;  %vm993_vm4 = vmor %vm991_vm3, %vm992_vm2  ;;  %v1012_v20 = vand.u32 2147483648, %v2568_v49  ;;  %vm1006_vm7 = vweird.f32 %v2568_v49  ;;  %v1010_v22 = vand.u32 2147483647, %v2568_v49 }
 0x155   : > { %v988_v57 = vsub.f32 1.0, %v987_v54 }
 0x156   : > { %vm1011_vm10 = vcmp.eq.f32.partialorder %v1010_v22, 8.507059e+37 }
 0x157   : > { %v989_v62 = vmul.f32 %v2183_v50, %v988_v57 }
 0x158   : > { %v2562_v44 = vpop.f32.mrf.mxu1 }
 0x159   : > { %v2077_v51 = vmul.f32 -1.442695, %v2562_v44  ;;  %v2185_v53 = vpop.eup %2184  ;;  %v990_v2 = vadd.f32 %v2183_v50, %v989_v62 }
 0x15a   : > { %v2577_v56 = vadd.f32 1.0, %v2185_v53  ;;  %v2187_v58 = vpop.eup %2186 }
 0x15b   : > { %2066 = vmatmul.msk.f32.gmra.mxu2 %vm686_vm1, %v727_v15  ;;  %2188 = vpow2.f32 %v2077_v51  ;;  %v1002_v63 = vmul.f32 %v2187_v58, %v2568_v49  ;;  %v994_v10 = vsel %vm993_vm4, %v2183_v50, %v990_v2  ;;  %vm1007_vm6 = vweird.f32 %v2187_v58 }
 0x15c   : > { %2190 = vrcp.f32 %v2577_v56  ;;  %v999_v15 = vsel %vm996_vm5, %v998_v14, %v994_v10  ;;  %vm1008_vm8 = vmor %vm1006_vm7, %vm1007_vm6  ;;  %v1027_v39 = vand.u32 2147483648, %v2577_v56  ;;  %vm1021_vm12 = vweird.f32 %v2577_v56 }
 0x15d   : > { %v1003_v3 = vsub.f32 1.0, %v1002_v63  ;;  %v1025_v41 = vand.u32 2147483647, %v2577_v56 }
 0x15f   : > { %v1004_v12 = vmul.f32 %v2187_v58, %v1003_v3  ;;  %vm1026_vm14 = vcmp.eq.f32.partialorder %v1025_v41, 8.507059e+37 }
 0x160   : > { %v2575_v55 = vpop.f32.mrf.mxu1 }
 0x161   : > { %v2078_v59 = vmul.f32 -1.442695, %v2575_v55  ;;  %v2189_v61 = vpop.eup %2188 }
 0x162   : > { %v2585_v0 = vadd.f32 1.0, %v2189_v61  ;;  %v2591_v4 = vpop.eup %2190 }
 0x163   : > { %2067 = vmatmul.msk.f32.gmra.mxu2 %vm686_vm1, %v728_v17  ;;  %2192 = vpow2.f32 %v2078_v59  ;;  %v1017_v13 = vmul.f32 %v2591_v4, %v2577_v56  ;;  %v1005_v17 = vadd.f32 %v2187_v58, %v1004_v12  ;;  %vm1022_vm11 = vweird.f32 %v2591_v4 }
 0x164   : > { %2194 = vrcp.f32 %v2585_v0  ;;  %vm1023_vm13 = vmor %vm1021_vm12, %vm1022_vm11  ;;  %vm1036_vm0 = vweird.f32 %v2585_v0  ;;  %v1040_v61 = vand.u32 2147483647, %v2585_v0 }
 0x165   : > { %v1009_v26 = vsel %vm1008_vm8, %v2187_v58, %v1005_v17  ;;  %v1042_v58 = vand.u32 2147483648, %v2585_v0 }
 0x166   : > { %vm1041_vm3 = vcmp.eq.f32.partialorder %v1040_v61, 8.507059e+37 }
 0x168   : > { %v2587_v1 = vpop.f32.mrf.mxu1 }
 0x169   : > { %v2079_v7 = vmul.f32 -1.442695, %v2587_v1  ;;  %v2193_v9 = vpop.eup %2192 }
 0x16a   : > { %v2599_v16 = vadd.f32 1.0, %v2193_v9  ;;  %v2601_v19 = vpop.eup %2194 }
 0x16b   : > { %2068 = vmatmul.msk.f32.gmra.mxu2 %vm686_vm1, %v729_v18  ;;  %2196 = vpow2.f32 %v2079_v7  ;;  %v1018_v18 = vsub.f32 1.0, %v1017_v13  ;;  %vm1037_vm15 = vweird.f32 %v2601_v19 }
 0x16c   : > { %2198 = vrcp.f32 %v2599_v16  ;;  %vm1038_vm2 = vmor %vm1036_vm0, %vm1037_vm15  ;;  %v1057_v13 = vand.u32 2147483648, %v2599_v16  ;;  %vm1051_vm5 = vweird.f32 %v2599_v16 }
 0x173   : > { %2069 = vmatmul.msk.f32.gmra.mxu2 %vm686_vm1, %v730_v21  ;;  %v1226_v21 = vmul.f32 %v999_v15, %v2542_v29  ;;  %v1013_v29 = vor.u32 1.1754944e-38, %v1012_v20  ;;  %v1055_v15 = vand.u32 2147483647, %v2599_v16 }
 0x175   : > { %v1014_v32 = vsel %vm1011_vm10, %v1013_v29, %v1009_v26  ;;  %vm1056_vm7 = vcmp.eq.f32.partialorder %v1055_v15, 8.507059e+37 }
 0x176   : > { %v2554_v36 = vpop.f32.mrf.mxu2  ;;  %v1227_v40 = vmul.f32 %v1014_v32, %v2544_v30  ;;  %v1028_v30 = vor.u32 1.1754944e-38, %v1027_v39 }
 0x17b   : > { %2070 = vmatmul.msk.f32.gmra.mxu2 %vm686_vm1, %v731_v23  ;;  %v2080_v23 = vmul.f32 -1.442695, %v2554_v36 }
 0x17d   : > { %2200 = vpow2.f32 %v2080_v23 }
 0x17e   : > { %v2564_v45 = vpop.f32.mrf.mxu2 }
 0x17f   : > { %v2081_v42 = vmul.f32 -1.442695, %v2564_v45 }
 0x183   : > { %2071 = vmatmul.msk.f32.gmra.mxu2 %vm686_vm1, %v732_v25  ;;  %v2197_v25 = vpop.eup %2196 }
 0x184   : > { %v2613_v34 = vadd.f32 1.0, %v2197_v25  ;;  %v2617_v38 = vpop.eup %2198 }
 0x185   : > { %v2201_v46 = vpop.eup %2200  ;;  %v1047_v49 = vmul.f32 %v2617_v38, %v2599_v16  ;;  %vm1052_vm4 = vweird.f32 %v2617_v38 }
 0x186   : > { %v2573_v52 = vpop.f32.mrf.mxu2  ;;  %2202 = vrcp.f32 %v2613_v34  ;;  %v2630_v53 = vadd.f32 1.0, %v2201_v46  ;;  %vm1053_vm6 = vmor %vm1051_vm5, %vm1052_vm4  ;;  %vm1066_vm10 = vweird.f32 %v2613_v34  ;;  %v1070_v32 = vand.u32 2147483647, %v2613_v34 }
 0x187   : > { %2204 = vpow2.f32 %v2081_v42  ;;  %v1048_v56 = vsub.f32 1.0, %v1047_v49  ;;  %v2082_v62 = vmul.f32 -1.442695, %v2573_v52 }
 0x188   : > { %2206 = vrcp.f32 %v2630_v53  ;;  %vm1071_vm12 = vcmp.eq.f32.partialorder %v1070_v32, 8.507059e+37  ;;  %v1087_v49 = vand.u32 2147483648, %v2630_v53 }
 0x189   : > { %2208 = vpow2.f32 %v2082_v62 }
 0x18b   : > { %2072 = vmatmul.msk.f32.gmra.mxu2 %vm686_vm1, %v733_v27  ;;  %v1019_v27 = vmul.f32 %v2591_v4, %v1018_v18 }
 0x18c   : > { %v2634_v57 = vpop.eup %2202 }
 0x18d   : > { %v1020_v35 = vadd.f32 %v2591_v4, %v1019_v27  ;;  %v2205_v2 = vpop.eup %2204  ;;  %v1062_v5 = vmul.f32 %v2634_v57, %v2613_v34  ;;  %vm1067_vm8 = vweird.f32 %v2634_v57 }
 0x18e   : > { %v2582_v60 = vpop.f32.mrf.mxu2  ;;  %v2647_v7 = vadd.f32 1.0, %v2205_v2  ;;  %v2651_v12 = vpop.eup %2206  ;;  %vm1068_vm11 = vmor %vm1066_vm10, %vm1067_vm8 }
 0x18f   : > { %v1024_v47 = vsel %vm1023_vm13, %v2591_v4, %v1020_v35  ;;  %v1049_v4 = vmul.f32 %v2617_v38, %v1048_v56  ;;  %v1063_v10 = vsub.f32 1.0, %v1062_v5  ;;  %v2083_v17 = vmul.f32 -1.442695, %v2582_v60 }
 0x190   : > { %v1029_v51 = vsel %vm1026_vm14, %v1028_v30, %v1024_v47  ;;  %2210 = vrcp.f32 %v2647_v7  ;;  %v1077_v22 = vmul.f32 %v2651_v12, %v2630_v53  ;;  %vm1082_vm13 = vweird.f32 %v2651_v12 }
 0x191   : > { %v1228_v59 = vmul.f32 %v1029_v51, %v2550_v33  ;;  %v1043_v33 = vor.u32 1.1754944e-38, %v1042_v58  ;;  %v1050_v9 = vadd.f32 %v2617_v38, %v1049_v4  ;;  %2212 = vpow2.f32 %v2083_v17 }
 0x192   : > { %v1078_v27 = vsub.f32 1.0, %v1077_v22  ;;  %vm1081_vm14 = vweird.f32 %v2630_v53  ;;  %v1085_v51 = vand.u32 2147483647, %v2630_v53  ;;  %v1102_v5 = vand.u32 2147483648, %v2647_v7 }
 0x193   : > { %2073 = vmatmul.msk.f32.gmra.mxu2 %vm686_vm1, %v2532_v28  ;;  %v1032_v28 = vmul.f32 %v2601_v19, %v2585_v0  ;;  %v1054_v20 = vsel %vm1053_vm6, %v2617_v38, %v1050_v9  ;;  %vm1083_vm15 = vmor %vm1081_vm14, %vm1082_vm13 }
 0x194   : > { %vm1086_vm0 = vcmp.eq.f32.partialorder %v1085_v51, 8.507059e+37  ;;  %v1103_v17 = vor.u32 1.1754944e-38, %v1102_v5 }
 0x195   : > { %v1033_v37 = vsub.f32 1.0, %v1032_v28 }
 0x196   : > { %v2595_v8 = vpop.f32.mrf.mxu2 }
 0x197   : > { %v1034_v48 = vmul.f32 %v2601_v19, %v1033_v37  ;;  %v2084_v35 = vmul.f32 -1.442695, %v2595_v8 }
 0x199   : > { %v1035_v54 = vadd.f32 %v2601_v19, %v1034_v48 }
 0x19b   : > { %v1039_v3 = vsel %vm1038_vm2, %v2601_v19, %v1035_v54  ;;  %v2209_v19 = vpop.eup %2208 }
 0x19c   : > { %v1044_v0 = vsel %vm1041_vm3, %v1043_v33, %v1039_v3  ;;  %v2670_v28 = vpop.eup %2210  ;;  %vm1096_vm3 = vweird.f32 %v2647_v7  ;;  %v1100_v33 = vand.u32 2147483647, %v2647_v7 }
 0x19d   : > { %v1229_v14 = vmul.f32 %v1044_v0, %v2562_v44  ;;  %v1058_v44 = vor.u32 1.1754944e-38, %v1057_v13  ;;  %v2213_v38 = vpop.eup %2212  ;;  %v1092_v41 = vmul.f32 %v2670_v28, %v2647_v7  ;;  %vm1097_vm2 = vweird.f32 %v2670_v28 }
 0x19e   : > { %v874_v24 = vpop.f32.mrf.mxu2  ;;  %v2666_v25 = vpop.f32.mrf.mxu3  ;;  %vm1098_vm4 = vmor %vm1096_vm3, %vm1097_vm2  ;;  %vm1101_vm5 = vcmp.eq.f32.partialorder %v1100_v33, 8.507059e+37 }
 0x19f   : > { %v1242_v31 = vmul.f32 %v1226_v21, %v874_v24  ;;  %v1064_v21 = vmul.f32 %v2634_v57, %v1063_v10  ;;  %v1059_v16 = vsel %vm1056_vm7, %v1058_v44, %v1054_v20  ;;  %v2664_v24 = vadd.f32 1.0, %v2209_v19 }
 0x1a0   : > { %v1230_v29 = vmul.f32 %v1059_v16, %v2575_v55  ;;  %v1093_v47 = vsub.f32 1.0, %v1092_v41  ;;  %v2085_v54 = vmul.f32 -1.442695, %v2666_v25 }
 0x1a1   : > { %2090 = vmatmul.msk.f32.vlgmr.msrb.gmra.mxu3 %vm1282_vm9, %v1242_v31  ;;  %v1065_v26 = vadd.f32 %v2634_v57, %v1064_v21  ;;  %v1072_v31 = vand.u32 2147483648, %v2613_v34  ;;  %2214 = vrcp.f32 %v2664_v24  ;;  %v1117_v22 = vand.u32 2147483648, %v2664_v24 }
 0x1a2   : > { %2216 = vpow2.f32 %v2084_v35  ;;  %vm1111_vm7 = vweird.f32 %v2664_v24  ;;  %v1115_v44 = vand.u32 2147483647, %v2664_v24 }
 0x1a3   : > { %v1069_v39 = vsel %vm1068_vm11, %v2634_v57, %v1065_v26  ;;  %v1073_v55 = vor.u32 1.1754944e-38, %v1072_v31  ;;  %v1118_v32 = vor.u32 1.1754944e-38, %v1117_v22 }
 0x1a4   : > { %vm1116_vm10 = vcmp.eq.f32.partialorder %v1115_v44, 8.507059e+37 }
 0x1a5   : > { %v1074_v34 = vsel %vm1071_vm12, %v1073_v55, %v1069_v39  ;;  %v1432_v55 = vld [vmem:[%s2343_s12 + $0x8] sm:$0xff] }
 0x1a6   : > { %v877_v43 = vpop.f32.mrf.mxu2  ;;  %v1231_v30 = vmul.f32 %v1074_v34, %v2587_v1  ;;  %v1088_v1 = vor.u32 1.1754944e-38, %v1087_v49 }
 0x1a7   : > { %v1243_v50 = vmul.f32 %v1227_v40, %v877_v43  ;;  %v1079_v40 = vmul.f32 %v2651_v12, %v1078_v27  ;;  %v2683_v43 = vadd.f32 1.0, %v2213_v38  ;;  %v2687_v48 = vpop.eup %2214  ;;  %v1431_v38 = vld [vmem:[%s2343_s12] sm:$0xff] }
 0x1a8   : > { %v2217_v57 = vpop.eup %2216  ;;  %v1107_v61 = vmul.f32 %v2687_v48, %v2664_v24  ;;  %vm1112_vm6 = vweird.f32 %v2687_v48 }
 0x1a9   : > { %2091 = vmatmul.msk.f32.gmra.mxu3 %vm1282_vm9, %v1243_v50  ;;  %v1080_v46 = vadd.f32 %v2651_v12, %v1079_v40  ;;  %v2690_v50 = vpop.f32.mrf.mxu3  ;;  %2218 = vrcp.f32 %v2683_v43  ;;  %vm2732_vm8 = vmor %vm1111_vm7, %vm1112_vm6  ;;  %vm1126_vm12 = vweird.f32 %v2683_v43 }
 0x1aa   : > { %2220 = vpow2.f32 %v2085_v54  ;;  %v1108_v3 = vsub.f32 1.0, %v1107_v61  ;;  %v2086_v0 = vmul.f32 -1.442695, %v2690_v50 }
 0x1ab   : > { %v1084_v58 = vsel %vm1083_vm15, %v2651_v12, %v1080_v46  ;;  %v1132_v46 = vand.u32 2147483648, %v2683_v43 }
 0x1ac   : > { %v1089_v53 = vsel %vm1086_vm0, %v1088_v1, %v1084_v58 }
 0x1ad   : > { %v1133_v58 = vor.u32 1.1754944e-38, %v1132_v46  ;;  %v1558_v46 = vld [vmem:[%s2348_s15 + $0x60] sm:$0xff] }
 0x1ae   : > { %v880_v63 = vpop.f32.mrf.mxu2 }
 0x1af   : > { %v1244_v6 = vmul.f32 %v1228_v59, %v880_v63  ;;  %v1094_v59 = vmul.f32 %v2670_v28, %v1093_v47  ;;  %v2702_v63 = vadd.f32 1.0, %v2217_v57  ;;  %v2706_v4 = vpop.eup %2218 }
 0x1b0   : > { %v2221_v12 = vpop.eup %2220  ;;  %vm1127_vm11 = vweird.f32 %v2706_v4 }
 0x1b1   : > { %2092 = vmatmul.msk.f32.gmra.mxu3 %vm1282_vm9, %v1244_v6  ;;  %v1095_v2 = vadd.f32 %v2670_v28, %v1094_v59  ;;  %v1232_v6 = vmul.f32 %v1089_v53, %v2554_v36  ;;  %2222 = vrcp.f32 %v2702_v63  ;;  %v2714_v9 = vpop.f32.mrf.mxu3  ;;  %v1122_v36 = vmul.f32 %v2706_v4, %v2683_v43  ;;  %vm1128_vm13 = vmor %vm1126_vm12, %vm1127_vm11 }
 0x1b2   : > { %2224 = vpow2.f32 %v2086_v0  ;;  %v2087_v16 = vmul.f32 -1.442695, %v2714_v9  ;;  %vm1141_vm0 = vweird.f32 %v2702_v63 }
 0x1b3   : > { %v1099_v13 = vsel %vm1098_vm4, %v2670_v28, %v1095_v2  ;;  %v1123_v20 = vsub.f32 1.0, %v1122_v36  ;;  %v1547_v2 = vld [vmem:[%s2348_s15 + $0x8] sm:$0xff] }
 0x1b4   : > { %v1104_v7 = vsel %vm1101_vm5, %v1103_v17, %v1099_v13 }
 0x1b6   : > { %v883_v18 = vpop.f32.mrf.mxu2 }
 0x1b7   : > { %v1245_v23 = vmul.f32 %v1229_v14, %v883_v18  ;;  %v1109_v14 = vmul.f32 %v2687_v48, %v1108_v3  ;;  %v2721_v18 = vadd.f32 1.0, %v2221_v12  ;;  %v2725_v21 = vpop.eup %2222 }
 0x1b8   : > { %v2225_v28 = vpop.eup %2224  ;;  %v1137_v24 = vmul.f32 %v2725_v21, %v2702_v63  ;;  %vm1142_vm15 = vweird.f32 %v2725_v21 }
 0x1b9   : > { %2093 = vmatmul.msk.f32.gmra.mxu3 %vm1282_vm9, %v1245_v23  ;;  %v1110_v19 = vadd.f32 %v2687_v48, %v1109_v14  ;;  %v1233_v23 = vmul.f32 %v1104_v7, %v2564_v45  ;;  %2226 = vrcp.f32 %v2721_v18  ;;  %v1124_v45 = vmul.f32 %v2706_v4, %v1123_v20  ;;  %v2743_v35 = vpop.f32.mrf.mxu3  ;;  %vm2780_vm2 = vmor %vm1141_vm0, %vm1142_vm15 }
 0x1ba   : > { %2228 = vpow2.f32 %v2087_v16  ;;  %v2747_v40 = vadd.f32 1.0, %v2225_v28  ;;  %v2088_v49 = vmul.f32 -1.442695, %v2743_v35  ;;  %vm1156_vm4 = vweird.f32 %v2721_v18 }
 0x1bb   : > { %v1114_v31 = vsel %vm2732_vm8, %v2687_v48, %v1110_v19  ;;  %v1125_v41 = vadd.f32 %v2706_v4, %v1124_v45  ;;  %v1130_v48 = vand.u32 2147483647, %v2683_v43  ;;  %v1546_v43 = vld [vmem:[%s2348_s15] sm:$0xff]  ;;  %v1160_v7 = vand.u32 2147483647, %v2721_v18 }
 0x1bc   : > { %v1119_v39 = vsel %vm1116_vm10, %v1118_v32, %v1114_v31  ;;  %2230 = vrcp.f32 %v2747_v40  ;;  %v1162_v19 = vand.u32 2147483648, %v2721_v18  ;;  %vm1171_vm8 = vweird.f32 %v2747_v40 }
 0x1bd   : > { %v1234_v47 = vmul.f32 %v1119_v39, %v2573_v52  ;;  %v1129_v54 = vsel %vm1128_vm13, %v2706_v4, %v1125_v41  ;;  %vm1131_vm14 = vcmp.eq.f32.partialorder %v1130_v48, 8.507059e+37  ;;  %2232 = vpow2.f32 %v2088_v49 }
 0x1be   : > { %v886_v37 = vpop.f32.mrf.mxu2  ;;  %v1134_v59 = vsel %vm1131_vm14, %v1133_v58, %v1129_v54  ;;  %v1147_v4 = vand.u32 2147483648, %v2702_v63  ;;  %vm1161_vm7 = vcmp.eq.f32.partialorder %v1160_v7, 8.507059e+37 }
 0x1bf   : > { %v1246_v42 = vmul.f32 %v1230_v29, %v886_v37  ;;  %v2268_v37 = vmov 0   ;;  %v2752_v34 = vpop.eup %2226  ;;  %v1235_v5 = vmul.f32 %v1134_v59, %v2582_v60 }
 0x1c0   : > { %2174 = vset.pattern.permute.xlu0 %v2268_v37  ;;  %2175 = vset.pattern.permute.xlu1 %v2268_v37  ;;  %v2229_v51 = vpop.eup %2228  ;;  %v1152_v52 = vmul.f32 %v2752_v34, %v2721_v18  ;;  %v1148_v36 = vor.u32 1.1754944e-38, %v1147_v4  ;;  %vm1157_vm5 = vweird.f32 %v2752_v34 }
 0x1c1   : > { %2094 = vmatmul.msk.f32.gmra.mxu3 %vm1282_vm9, %v1246_v42  ;;  %1451 = vperm.xlu0 %2174, %v1431_v38   ;;  %v1138_v42 = vsub.f32 1.0, %v1137_v24  ;;  %v2766_v61 = vadd.f32 1.0, %v2229_v51  ;;  %vm2803_vm6 = vmor %vm1156_vm4, %vm1157_vm5  ;;  %v1177_v38 = vand.u32 2147483648, %v2747_v40 }
 0x1c2   : > { %2176 = vset.pattern.permute.xlu2 %v2268_v37  ;;  %1454 = vperm.xlu1 %2175, %v1432_v55   ;;  %v1153_v53 = vsub.f32 1.0, %v1152_v52  ;;  %v2773_v3 = vpop.eup %2230  ;;  %v1175_v37 = vand.u32 2147483647, %v2747_v40  ;;  %v1436_v55 = vld [vmem:[%s2343_s12 + $0x28] sm:$0xff] }
 0x1c3   : > { %2234 = vrcp.f32 %v2766_v61  ;;  %v2233_v12 = vpop.eup %2232  ;;  %vm1172_vm10 = vweird.f32 %v2773_v3  ;;  %vm1186_vm13 = vweird.f32 %v2766_v61  ;;  %v1192_v58 = vand.u32 2147483648, %v2766_v61 }
 0x1c4   : > { %v1154_v60 = vmul.f32 %v2752_v34, %v1153_v53  ;;  %v2797_v20 = vadd.f32 1.0, %v2233_v12  ;;  %vm2827_vm11 = vmor %vm1171_vm8, %vm1172_vm10  ;;  %vm1176_vm12 = vcmp.eq.f32.partialorder %v1175_v37, 8.507059e+37  ;;  %v1553_v12 = vld [vmem:[%s2348_s15 + $0x38] sm:$0xff]  ;;  %v1556_v37 = vld [vmem:[%s2348_s15 + $0x50] sm:$0xff] }
 0x1c6   : > { %v889_v56 = vpop.f32.mrf.mxu2 }
 0x1c7   : > { %v1247_v62 = vmul.f32 %v1231_v30, %v889_v56  ;;  %v1139_v56 = vmul.f32 %v2725_v21, %v1138_v42 }
 0x1c9   : > { %2095 = vmatmul.msk.f32.gmra.mxu3 %vm1282_vm9, %v1247_v62  ;;  %v2768_v62 = vpop.f32.mrf.mxu3  ;;  %1564 = vperm.xlu0 %2174, %v1546_v43   ;;  %v1140_v1 = vadd.f32 %v2725_v21, %v1139_v56  ;;  %v2801_v44 = vpop.eup %2234  ;;  %v1552_v56 = vld [vmem:[%s2348_s15 + $0x30] sm:$0xff]  ;;  %v2269_v43 = vmov 0.0  }
 0x1ca   : > { %1569 = vperm.xlu1 %2175, %v1547_v2   ;;  %v2089_v33 = vmul.f32 -1.442695, %v2768_v62  ;;  %v1182_v24 = vmul.f32 %v2801_v44, %v2766_v61  ;;  %vm1187_vm14 = vweird.f32 %v2801_v44  ;;  %703 = vst.msk [vmem:[#allocation4] sm:$0xff] %vm686_vm1, %v2269_v43  ;;  %v1557_v2 = vld [vmem:[%s2348_s15 + $0x58] sm:$0xff] }
 0x1cb   : > { %v1144_v13 = vsel %vm2780_vm2, %v2725_v21, %v1140_v1  ;;  %v1155_v21 = vadd.f32 %v2752_v34, %v1154_v60  ;;  %704 = vst.msk [vmem:[#allocation4 + $0x8] sm:$0xff] %vm686_vm1, %v2269_v43  ;;  %vm2855_vm15 = vmor %vm1186_vm13, %vm1187_vm14  ;;  %vm1201_vm2 = vweird.f32 %v2797_v20  ;;  %v1207_v60 = vand.u32 2147483648, %v2797_v20 }
 0x1cc   : > { %2236 = vpow2.f32 %v2089_v33  ;;  %v1183_v42 = vsub.f32 1.0, %v1182_v24  ;;  %705 = vst.msk [vmem:[#allocation4 + $0x10] sm:$0xff] %vm686_vm1, %v2269_v43 }
 0x1cd   : > { %2238 = vrcp.f32 %v2797_v20  ;;  %v1159_v31 = vsel %vm2803_vm6, %v2752_v34, %v1155_v21  ;;  %706 = vst.msk [vmem:[#allocation4 + $0x18] sm:$0xff] %vm686_vm1, %v2269_v43 }
 0x1ce   : > { %v892_v10 = vpop.f32.mrf.mxu2  ;;  %707 = vst.msk [vmem:[#allocation4 + $0x20] sm:$0xff] %vm686_vm1, %v2269_v43 }
 0x1cf   : > { %v1248_v15 = vmul.f32 %v1232_v6, %v892_v10  ;;  %v1145_v6 = vand.u32 2147483647, %v2702_v63  ;;  %v1167_v63 = vmul.f32 %v2773_v3, %v2747_v40  ;;  %v1178_v40 = vor.u32 1.1754944e-38, %v1177_v38  ;;  %708 = vst.msk [vmem:[#allocation4 + $0x28] sm:$0xff] %vm686_vm1, %v2269_v43 }
 0x1d0   : > { %709 = vst.msk [vmem:[#allocation4 + $0x30] sm:$0xff] %vm686_vm1, %v2269_v43 }
 0x1d1   : > { %2096 = vmatmul.msk.f32.gmra.mxu3 %vm1282_vm9, %v1248_v15  ;;  %vm1146_vm3 = vcmp.eq.f32.partialorder %v1145_v6, 8.507059e+37  ;;  %v1434_v15 = vld [vmem:[%s2343_s12 + $0x18] sm:$0xff]  ;;  %v1168_v22 = vsub.f32 1.0, %v1167_v63  ;;  %710 = vst.msk [vmem:[#allocation4 + $0x38] sm:$0xff] %vm686_vm1, %v2269_v43 }
 0x1d2   : > { %v1149_v17 = vsel %vm1146_vm3, %v1148_v36, %v1144_v13  ;;  %1460 = vperm.xlu0 %2174, %v1434_v15   ;;  %v2237_v28 = vpop.eup %2236  ;;  %711 = vst.msk [vmem:[#allocation4 + $0x40] sm:$0xff] %vm686_vm1, %v2269_v43  ;;  %v1439_v15 = vld [vmem:[%s2343_s12 + $0x40] sm:$0xff] }
 0x1d3   : > { %v1236_v26 = vmul.f32 %v1149_v17, %v2595_v8  ;;  %v1169_v45 = vmul.f32 %v2773_v3, %v1168_v22  ;;  %v1550_v8 = vld [vmem:[%s2348_s15 + $0x20] sm:$0xff]  ;;  %v2821_v39 = vadd.f32 1.0, %v2237_v28  ;;  %v2825_v34 = vpop.eup %2238  ;;  %712 = vst.msk [vmem:[#allocation4 + $0x48] sm:$0xff] %vm686_vm1, %v2269_v43  ;;  %v1555_v28 = vld [vmem:[%s2348_s15 + $0x48] sm:$0xff] }
 0x1d4   : > { %v1197_v51 = vmul.f32 %v2825_v34, %v2797_v20  ;;  %vm1202_vm3 = vweird.f32 %v2825_v34  ;;  %713 = vst.msk [vmem:[#allocation4 + $0x50] sm:$0xff] %vm686_vm1, %v2269_v43 }
 0x1d5   : > { %v1170_v41 = vadd.f32 %v2773_v3, %v1169_v45  ;;  %2240 = vrcp.f32 %v2821_v39  ;;  %vm2897_vm4 = vmor %vm1201_vm2, %vm1202_vm3  ;;  %714 = vst.msk [vmem:[#allocation4 + $0x58] sm:$0xff] %vm686_vm1, %v2269_v43  ;;  %vm1216_vm6 = vweird.f32 %v2821_v39 }
 0x1d6   : > { %v895_v27 = vpop.f32.mrf.mxu2  ;;  %v1198_v1 = vsub.f32 1.0, %v1197_v51  ;;  %715 = vst.msk [vmem:[#allocation4 + $0x60] sm:$0xff] %vm686_vm1, %v2269_v43  ;;  %v1554_v51 = vld [vmem:[%s2348_s15 + $0x40] sm:$0xff] }
 0x1d7   : > { %v1249_v29 = vmul.f32 %v1233_v23, %v895_v27  ;;  %v1549_v23 = vld [vmem:[%s2348_s15 + $0x18] sm:$0xff]  ;;  %v1163_v27 = vor.u32 1.1754944e-38, %v1162_v19  ;;  %v1174_v49 = vsel %vm2827_vm11, %v2773_v3, %v1170_v41  ;;  %v1208_v19 = vor.u32 1.1754944e-38, %v1207_v60  ;;  %716 = vst.msk [vmem:[#allocation4 + $0x68] sm:$0xff] %vm686_vm1, %v2269_v43  ;;  %v1264_v60 = vld [vmem:[#allocation4 + $0x30] sm:$0xff] }
 0x1d8   : > { %1579 = vperm.xlu1 %2175, %v1549_v23   ;;  %v1179_v52 = vsel %vm1176_vm12, %v1178_v40, %v1174_v49  ;;  %v1199_v33 = vmul.f32 %v2825_v34, %v1198_v1  ;;  %717 = vst.msk [vmem:[#allocation4 + $0x70] sm:$0xff] %vm686_vm1, %v2269_v43  ;;  %v1559_v40 = vld [vmem:[%s2348_s15 + $0x68] sm:$0xff] }
 0x1d9   : > { %2097 = vmatmul.msk.f32.gmra.mxu3 %vm1282_vm9, %v1249_v29  ;;  %v1164_v32 = vsel %vm1161_vm7, %v1163_v27, %v1159_v31  ;;  %v1238_v3 = vmul.f32 %v1179_v52, %v2690_v50  ;;  %718 = vst.msk [vmem:[#allocation4 + $0x78] sm:$0xff] %vm686_vm1, %v2269_v43 }
 0x1da   : > { %1584 = vperm.xlu0 %2174, %v1550_v8   ;;  %v1200_v63 = vadd.f32 %v2825_v34, %v1199_v33 }
 0x1db   : > { %v2851_v53 = vpop.eup %2240 }
 0x1dc   : > { %v1212_v50 = vmul.f32 %v2851_v53, %v2821_v39  ;;  %v1204_v21 = vsel %vm2897_vm4, %v2825_v34, %v1200_v63  ;;  %vm1217_vm7 = vweird.f32 %v2851_v53  ;;  %v1443_v34 = vld [vmem:[%s2343_s12 + $0x60] sm:$0xff] }
 0x1dd   : > { %vm1218_vm8 = vmor %vm1216_vm6, %vm1217_vm7 }
 0x1de   : > { %v898_v30 = vpop.f32.mrf.mxu2  ;;  %v1213_v36 = vsub.f32 1.0, %v1212_v50 }
 0x1df   : > { %v1250_v57 = vmul.f32 %v1234_v47, %v898_v30  ;;  %v1237_v47 = vmul.f32 %v1164_v32, %v2666_v25  ;;  %v1184_v30 = vmul.f32 %v2801_v44, %v1183_v42  ;;  %v1437_v25 = vld [vmem:[%s2343_s12 + $0x30] sm:$0xff]  ;;  %v1435_v32 = vld [vmem:[%s2343_s12 + $0x20] sm:$0xff] }
 0x1e0   : > { %1466 = vperm.xlu1 %2175, %v1436_v55   ;;  %v1214_v22 = vmul.f32 %v2851_v53, %v1213_v36  ;;  %v1551_v55 = vld [vmem:[%s2348_s15 + $0x28] sm:$0xff]  ;;  %v1265_v36 = vld [vmem:[#allocation4 + $0x38] sm:$0xff] }
 0x1e1   : > { %2098 = vmatmul.msk.f32.gmra.mxu3 %vm1282_vm9, %v1250_v57  ;;  %v1190_v57 = vand.u32 2147483647, %v2766_v61  ;;  %v1185_v59 = vadd.f32 %v2801_v44, %v1184_v30 }
 0x1e2   : > { %1469 = vperm.xlu0 %2174, %v1437_v25   ;;  %v1215_v27 = vadd.f32 %v2851_v53, %v1214_v22  ;;  %v1259_v25 = vld [vmem:[#allocation4 + $0x8] sm:$0xff] }
 0x1e3   : > { %vm2864_vm0 = vcmp.eq.f32.partialorder %v1190_v57, 8.507059e+37  ;;  %v1189_v6 = vsel %vm2855_vm15, %v2801_v44, %v1185_v59  ;;  %v1440_v44 = vld [vmem:[%s2343_s12 + $0x48] sm:$0xff]  ;;  %v1260_v59 = vld [vmem:[#allocation4 + $0x10] sm:$0xff] }
 0x1e6   : > { %v901_v10 = vpop.f32.mrf.mxu2 }
 0x1e7   : > { %v1251_v14 = vmul.f32 %v1235_v5, %v901_v10  ;;  %v1193_v5 = vor.u32 1.1754944e-38, %v1192_v58  ;;  %v1433_v10 = vld [vmem:[%s2343_s12 + $0x10] sm:$0xff] }
 0x1e8   : > { %1594 = vperm.xlu1 %2175, %v1552_v56   ;;  %1457 = vperm.xlu2 %2176, %v1433_v10   ;;  %v1561_v56 = vld [vmem:[%s2348_s15 + $0x78] sm:$0xff]  ;;  %v1441_v58 = vld [vmem:[%s2343_s12 + $0x50] sm:$0xff] }
 0x1e9   : > { %2099 = vmatmul.msk.f32.gmra.mxu3 %vm1282_vm9, %v1251_v14  ;;  %v1194_v13 = vsel %vm2864_vm0, %v1193_v5, %v1189_v6  ;;  %v1205_v14 = vand.u32 2147483647, %v2797_v20  ;;  %v1262_v6 = vld [vmem:[#allocation4 + $0x20] sm:$0xff]  ;;  %v1560_v10 = vld [vmem:[%s2348_s15 + $0x70] sm:$0xff] }
 0x1ea   : > { %1599 = vperm.xlu0 %2174, %v1553_v12   ;;  %v1239_v7 = vmul.f32 %v1194_v13, %v2714_v9  ;;  %v1548_v9 = vld [vmem:[%s2348_s15 + $0x10] sm:$0xff] }
 0x1eb   : > { %vm1206_vm5 = vcmp.eq.f32.partialorder %v1205_v14, 8.507059e+37 }
 0x1ec   : > { %v1209_v16 = vsel %vm1206_vm5, %v1208_v19, %v1204_v21  ;;  %v1267_v21 = vld [vmem:[#allocation4 + $0x48] sm:$0xff] }
 0x1ed   : > { %v1240_v31 = vmul.f32 %v1209_v16, %v2743_v35 }
 0x1ee   : > { %v904_v18 = vpop.f32.mrf.mxu2 }
 0x1ef   : > { %v1252_v29 = vmul.f32 %v1236_v26, %v904_v18  ;;  %v1222_v26 = vand.u32 2147483648, %v2821_v39  ;;  %v1220_v18 = vand.u32 2147483647, %v2821_v39  ;;  %v1442_v39 = vld [vmem:[%s2343_s12 + $0x58] sm:$0xff] }
 0x1f0   : > { %1475 = vperm.xlu1 %2175, %v1439_v15   ;;  %1574 = vperm.xlu2 %2176, %v1548_v9   ;;  %v1268_v9 = vld [vmem:[#allocation4 + $0x50] sm:$0xff] }
 0x1f1   : > { %2100 = vmatmul.msk.f32.gmra.mxu3 %vm1282_vm9, %v1252_v29  ;;  %v1223_v45 = vor.u32 1.1754944e-38, %v1222_v26  ;;  %v1219_v29 = vsel %vm1218_vm8, %v2851_v53, %v1215_v27  ;;  %vm1221_vm10 = vcmp.eq.f32.partialorder %v1220_v18, 8.507059e+37  ;;  %v1269_v26 = vld [vmem:[#allocation4 + $0x58] sm:$0xff] }
 0x1f2   : > { %1478 = vperm.xlu0 %2174, %v1440_v44  }
 0x1f3   : > { %v1224_v38 = vsel %vm1221_vm10, %v1223_v45, %v1219_v29 }
 0x1f4   : > { %v1241_v35 = vmul.f32 %v1224_v38, %v2768_v62  ;;  %v1445_v62 = vld [vmem:[%s2343_s12 + $0x70] sm:$0xff] }
 0x1f6   : > { %v907_v48 = vpop.f32.mrf.mxu2 }
 0x1f7   : > { %v1253_v54 = vmul.f32 %v1237_v47, %v907_v48  ;;  %v1438_v47 = vld [vmem:[%s2343_s12 + $0x38] sm:$0xff]  ;;  %v1258_v48 = vld [vmem:[#allocation4] sm:$0xff] }
 0x1f8   : > { %1609 = vperm.xlu1 %2175, %v1555_v28   ;;  %1463 = vperm.xlu2 %2176, %v1435_v32   ;;  %v1270_v28 = vld [vmem:[#allocation4 + $0x60] sm:$0xff]  ;;  %v1272_v32 = vld [vmem:[#allocation4 + $0x70] sm:$0xff] }
 0x1f9   : > { %2101 = vmatmul.msk.f32.gmra.mxu3 %vm1282_vm9, %v1253_v54  ;;  %v1446_v54 = vld [vmem:[%s2343_s12 + $0x78] sm:$0xff] }
 0x1fa   : > { %1614 = vperm.xlu0 %2174, %v1556_v37  }
 0x1fe   : > { %v910_v61 = vpop.f32.mrf.mxu2 }
 0x1ff   : > { %v1254_v0 = vmul.f32 %v1238_v3, %v910_v61  ;;  %v1261_v3 = vld [vmem:[#allocation4 + $0x18] sm:$0xff]  ;;  %v1444_v61 = vld [vmem:[%s2343_s12 + $0x68] sm:$0xff] }
 0x200   : > { %1484 = vperm.xlu1 %2175, %v1442_v39   ;;  %1589 = vperm.xlu2 %2176, %v1551_v55   ;;  %v1273_v39 = vld [vmem:[#allocation4 + $0x78] sm:$0xff] }
 0x201   : > { %2102 = vmatmul.msk.f32.gmra.mxu3 %vm1282_vm9, %v1254_v0  ;;  %v1263_v0 = vld [vmem:[#allocation4 + $0x28] sm:$0xff] }
 0x202   : > { %1487 = vperm.xlu0 %2174, %v1443_v34  }
 0x206   : > { %v913_v20 = vpop.f32.mrf.mxu2 }
 0x207   : > { %v1255_v23 = vmul.f32 %v1239_v7, %v913_v20  ;;  %v1266_v7 = vld [vmem:[#allocation4 + $0x40] sm:$0xff] }
 0x208   : > { %1624 = vperm.xlu1 %2175, %v1558_v46   ;;  %1472 = vperm.xlu2 %2176, %v1438_v47  }
 0x209   : > { %2103 = vmatmul.msk.f32.gmra.mxu3 %vm1282_vm9, %v1255_v23 }
 0x20a   : > { %1629 = vperm.xlu0 %2174, %v1559_v40  }
 0x20e   : > { %v916_v24 = vpop.f32.mrf.mxu2 }
 0x20f   : > { %v1256_v8 = vmul.f32 %v1240_v31, %v916_v24  ;;  %v1271_v24 = vld [vmem:[#allocation4 + $0x68] sm:$0xff] }
 0x210   : > { %1493 = vperm.xlu1 %2175, %v1445_v62   ;;  %1604 = vperm.xlu2 %2176, %v1554_v51  }
 0x211   : > { %2104 = vmatmul.msk.f32.gmra.mxu3 %vm1282_vm9, %v1256_v8 }
 0x212   : > { %1496 = vperm.xlu0 %2174, %v1446_v54  }
 0x216   : > { %v919_v41 = vpop.f32.mrf.mxu2 }
 0x217   : > { %v1257_v42 = vmul.f32 %v1241_v35, %v919_v41 }
 0x218   : > { %1639 = vperm.xlu1 %2175, %v1561_v56   ;;  %1481 = vperm.xlu2 %2176, %v1441_v58  }
 0x219   : > { %2105 = vmatmul.msk.f32.gmra.mxu3 %vm1282_vm9, %v1257_v42 }
 0x220   : > { %1619 = vperm.xlu2 %2176, %v1557_v2  }
 0x224   : > { %v1348_v49 = vpop.f32.mrf.mxu3 }
 0x225   : > { %v1396_v30 = vadd.f32 %v1348_v49, %v1258_v48  ;;  %v1448_v49 = vand.u32 127, %v523_v11 }
 0x227   : > { %1412 = vst.msk [vmem:[#allocation4] sm:$0xff] %vm686_vm1, %v1396_v30 }
 0x228   : > { %1490 = vperm.xlu2 %2176, %v1444_v61  }
 0x22c   : > { %v1351_v52 = vpop.f32.mrf.mxu3 }
 0x22d   : > { %v1397_v57 = vadd.f32 %v1351_v52, %v1259_v25  ;;  %v2965_v25 = vadd.s32 1, %v1448_v49 }
 0x22f   : > { %1413 = vst.msk [vmem:[#allocation4 + $0x8] sm:$0xff] %vm686_vm1, %v1397_v57 }
 0x230   : > { %1634 = vperm.xlu2 %2176, %v1560_v10  }
 0x233   : > { %v1452_v54 = vpop.permute.xlu0 %1451 }
 0x234   : > { %v1354_v1 = vpop.f32.mrf.mxu3  ;;  %vm1498_vm9 = vcmp.eq.s32.totalorder %v1452_v54, %v2965_v25 }
 0x235   : > { %v1398_v53 = vadd.f32 %v1354_v1, %v1260_v59  ;;  %v1455_v59 = vpop.permute.xlu1 %1454  ;;  %v2106_v1 = vsel %vm1498_vm9, 1.0, %v2269_v43 }
 0x236   : > { %v1675_v11 = vld [vmem:[#allocation4 + $0x8] sm:$0xff]  ;;  %vm1499_vm11 = vcmp.eq.s32.totalorder %v1455_v59, %v2965_v25 }
 0x237   : > { %1414 = vst.msk [vmem:[#allocation4 + $0x10] sm:$0xff] %vm686_vm1, %v1398_v53 }
 0x23b   : > { %v1565_v53 = vpop.permute.xlu0 %1564 }
 0x23c   : > { %v1357_v4 = vpop.f32.mrf.mxu3  ;;  %v1642_v2 = vmul.f32 %v2106_v1, %v1565_v53  ;;  %v1658_v53 = vld [vmem:[#allocation2] sm:$0xff] }
 0x23d   : > { %v1399_v5 = vadd.f32 %v1357_v4, %v1261_v3  ;;  %v1674_v3 = vld [vmem:[#allocation4] sm:$0xff]  ;;  %v2107_v4 = vsel %vm1499_vm11, 1.0, %v2269_v43  ;;  %v1570_v61 = vpop.permute.xlu1 %1569 }
 0x23e   : > { %v1676_v58 = vld [vmem:[#allocation4 + $0x10] sm:$0xff] }
 0x23f   : > { %1415 = vst.msk [vmem:[#allocation4 + $0x18] sm:$0xff] %vm686_vm1, %v1399_v5 }
 0x242   : > { %v1458_v5 = vpop.permute.xlu2 %1457 }
 0x243   : > { %vm1500_vm12 = vcmp.eq.s32.totalorder %v1458_v5, %v2965_v25 }
 0x244   : > { %v1360_v33 = vpop.f32.mrf.mxu3  ;;  %v1461_v10 = vpop.permute.xlu0 %1460 }
 0x245   : > { %v1400_v50 = vadd.f32 %v1360_v33, %v1262_v6  ;;  %v1643_v6 = vmul.f32 %v2107_v4, %v1570_v61  ;;  %v2108_v33 = vsel %vm1500_vm12, 1.0, %v2269_v43  ;;  %vm1501_vm13 = vcmp.eq.s32.totalorder %v1461_v10, %v2965_v25  ;;  %v1659_v4 = vld [vmem:[#allocation2 + $0x8] sm:$0xff]  ;;  %v1662_v10 = vld [vmem:[#allocation2 + $0x20] sm:$0xff] }
 0x246   : > { %v1677_v57 = vld [vmem:[#allocation4 + $0x18] sm:$0xff] }
 0x247   : > { %1416 = vst.msk [vmem:[#allocation4 + $0x20] sm:$0xff] %vm686_vm1, %v1400_v50 }
 0x24a   : > { %v1575_v50 = vpop.permute.xlu2 %1574 }
 0x24c   : > { %v1363_v12 = vpop.f32.mrf.mxu3 }
 0x24d   : > { %v1401_v13 = vadd.f32 %v1363_v12, %v1263_v0  ;;  %v1644_v0 = vmul.f32 %v2108_v33, %v1575_v50  ;;  %v2109_v12 = vsel %vm1501_vm13, 1.0, %v2269_v43  ;;  %v1661_v50 = vld [vmem:[#allocation2 + $0x18] sm:$0xff] }
 0x24e   : > { %v1678_v52 = vld [vmem:[#allocation4 + $0x20] sm:$0xff] }
 0x24f   : > { %1417 = vst.msk [vmem:[#allocation4 + $0x28] sm:$0xff] %vm686_vm1, %v1401_v13  ;;  %v1580_v13 = vpop.permute.xlu1 %1579 }
 0x254   : > { %v1366_v63 = vpop.f32.mrf.mxu3 }
 0x255   : > { %v1402_v14 = vadd.f32 %v1366_v63, %v1264_v60  ;;  %v1645_v60 = vmul.f32 %v2109_v12, %v1580_v13  ;;  %v1464_v63 = vpop.permute.xlu2 %1463 }
 0x256   : > { %v1679_v56 = vld [vmem:[#allocation4 + $0x28] sm:$0xff]  ;;  %vm1502_vm14 = vcmp.eq.s32.totalorder %v1464_v63, %v2965_v25 }
 0x257   : > { %1418 = vst.msk [vmem:[#allocation4 + $0x30] sm:$0xff] %vm686_vm1, %v1402_v14  ;;  %v2110_v14 = vsel %vm1502_vm14, 1.0, %v2269_v43 }
 0x25c   : > { %v1369_v15 = vpop.f32.mrf.mxu3 }
 0x25d   : > { %v1403_v17 = vadd.f32 %v1369_v15, %v1265_v36  ;;  %v1585_v36 = vpop.permute.xlu0 %1584 }
 0x25e   : > { %v1680_v51 = vld [vmem:[#allocation4 + $0x30] sm:$0xff]  ;;  %v1646_v15 = vmul.f32 %v2110_v14, %v1585_v36 }
 0x25f   : > { %1419 = vst.msk [vmem:[#allocation4 + $0x38] sm:$0xff] %vm686_vm1, %v1403_v17  ;;  %v1467_v17 = vpop.permute.xlu1 %1466  ;;  %v1664_v36 = vld [vmem:[#allocation2 + $0x30] sm:$0xff] }
 0x260   : > { %vm1503_vm15 = vcmp.eq.s32.totalorder %v1467_v17, %v2965_v25 }
 0x264   : > { %v1372_v19 = vpop.f32.mrf.mxu3 }
 0x265   : > { %v1404_v20 = vadd.f32 %v1372_v19, %v1266_v7  ;;  %v2111_v7 = vsel %vm1503_vm15, 1.0, %v2269_v43  ;;  %v1590_v19 = vpop.permute.xlu2 %1589 }
 0x266   : > { %v1681_v30 = vld [vmem:[#allocation4 + $0x38] sm:$0xff] }
 0x267   : > { %1420 = vst.msk [vmem:[#allocation4 + $0x40] sm:$0xff] %vm686_vm1, %v1404_v20  ;;  %v1647_v20 = vmul.f32 %v2111_v7, %v1590_v19  ;;  %v1665_v7 = vld [vmem:[#allocation2 + $0x38] sm:$0xff] }
 0x26c   : > { %v1375_v22 = vpop.f32.mrf.mxu3 }
 0x26d   : > { %v1405_v23 = vadd.f32 %v1375_v22, %v1267_v21  ;;  %v1470_v21 = vpop.permute.xlu0 %1469 }
 0x26e   : > { %v1682_v62 = vld [vmem:[#allocation4 + $0x40] sm:$0xff]  ;;  %vm1504_vm0 = vcmp.eq.s32.totalorder %v1470_v21, %v2965_v25 }
 0x26f   : > { %1421 = vst.msk [vmem:[#allocation4 + $0x48] sm:$0xff] %vm686_vm1, %v1405_v23  ;;  %v2112_v22 = vsel %vm1504_vm0, 1.0, %v2269_v43  ;;  %v1595_v23 = vpop.permute.xlu1 %1594  ;;  %v1666_v21 = vld [vmem:[#allocation2 + $0x40] sm:$0xff] }
 0x274   : > { %v1378_v44 = vpop.f32.mrf.mxu3 }
 0x275   : > { %v1406_v16 = vadd.f32 %v1378_v44, %v1268_v9  ;;  %v1648_v9 = vmul.f32 %v2112_v22, %v1595_v23  ;;  %v1473_v44 = vpop.permute.xlu2 %1472 }
 0x276   : > { %v1683_v48 = vld [vmem:[#allocation4 + $0x48] sm:$0xff]  ;;  %vm1505_vm2 = vcmp.eq.s32.totalorder %v1473_v44, %v2965_v25 }
 0x277   : > { %1422 = vst.msk [vmem:[#allocation4 + $0x50] sm:$0xff] %vm686_vm1, %v1406_v16  ;;  %v2113_v16 = vsel %vm1505_vm2, 1.0, %v2269_v43 }
 0x27c   : > { %v1381_v27 = vpop.f32.mrf.mxu3 }
 0x27d   : > { %v1407_v18 = vadd.f32 %v1381_v27, %v1269_v26  ;;  %v1600_v26 = vpop.permute.xlu0 %1599 }
 0x27e   : > { %v1684_v40 = vld [vmem:[#allocation4 + $0x50] sm:$0xff]  ;;  %v1649_v27 = vmul.f32 %v2113_v16, %v1600_v26 }
 0x27f   : > { %1423 = vst.msk [vmem:[#allocation4 + $0x58] sm:$0xff] %vm686_vm1, %v1407_v18  ;;  %v1476_v18 = vpop.permute.xlu1 %1475  ;;  %v1668_v26 = vld [vmem:[#allocation2 + $0x50] sm:$0xff] }
 0x280   : > { %vm1506_vm3 = vcmp.eq.s32.totalorder %v1476_v18, %v2965_v25 }
 0x284   : > { %v1384_v31 = vpop.f32.mrf.mxu3 }
 0x285   : > { %v1408_v45 = vadd.f32 %v1384_v31, %v1270_v28  ;;  %v2114_v28 = vsel %vm1506_vm3, 1.0, %v2269_v43  ;;  %v1605_v31 = vpop.permute.xlu2 %1604 }
 0x286   : > { %v1685_v47 = vld [vmem:[#allocation4 + $0x58] sm:$0xff] }
 0x287   : > { %1424 = vst.msk [vmem:[#allocation4 + $0x60] sm:$0xff] %vm686_vm1, %v1408_v45  ;;  %v1650_v45 = vmul.f32 %v2114_v28, %v1605_v31  ;;  %v1669_v28 = vld [vmem:[#allocation2 + $0x58] sm:$0xff] }
 0x28c   : > { %v1387_v29 = vpop.f32.mrf.mxu3 }
 0x28d   : > { %v1409_v8 = vadd.f32 %v1387_v29, %v1271_v24  ;;  %v1479_v24 = vpop.permute.xlu0 %1478 }
 0x28e   : > { %v1686_v46 = vld [vmem:[#allocation4 + $0x60] sm:$0xff]  ;;  %vm1507_vm4 = vcmp.eq.s32.totalorder %v1479_v24, %v2965_v25 }
 0x28f   : > { %1425 = vst.msk [vmem:[#allocation4 + $0x68] sm:$0xff] %vm686_vm1, %v1409_v8  ;;  %v2115_v29 = vsel %vm1507_vm4, 1.0, %v2269_v43  ;;  %v1610_v8 = vpop.permute.xlu1 %1609  ;;  %v1670_v24 = vld [vmem:[#allocation2 + $0x60] sm:$0xff] }
 0x294   : > { %v1390_v37 = vpop.f32.mrf.mxu3 }
 0x295   : > { %v1410_v38 = vadd.f32 %v1390_v37, %v1272_v32  ;;  %v1651_v32 = vmul.f32 %v2115_v29, %v1610_v8  ;;  %v1482_v37 = vpop.permute.xlu2 %1481 }
 0x296   : > { %v1687_v34 = vld [vmem:[#allocation4 + $0x68] sm:$0xff]  ;;  %vm1508_vm5 = vcmp.eq.s32.totalorder %v1482_v37, %v2965_v25 }
 0x297   : > { %1426 = vst.msk [vmem:[#allocation4 + $0x70] sm:$0xff] %vm686_vm1, %v1410_v38  ;;  %v2116_v38 = vsel %vm1508_vm5, 1.0, %v2269_v43 }
 0x29c   : > { %v1393_v35 = vpop.f32.mrf.mxu3 }
 0x29d   : > { %v1411_v41 = vadd.f32 %v1393_v35, %v1273_v39  ;;  %v1615_v39 = vpop.permute.xlu0 %1614 }
 0x29e   : > { %v1688_v55 = vld [vmem:[#allocation4 + $0x70] sm:$0xff]  ;;  %v1652_v35 = vmul.f32 %v2116_v38, %v1615_v39 }
 0x29f   : > { %1427 = vst.msk [vmem:[#allocation4 + $0x78] sm:$0xff] %vm686_vm1, %v1411_v41  ;;  %v1485_v41 = vpop.permute.xlu1 %1484  ;;  %v1672_v39 = vld [vmem:[#allocation2 + $0x70] sm:$0xff] }
 0x2a0   : > { %vm1509_vm6 = vcmp.eq.s32.totalorder %v1485_v41, %v2965_v25 }
 0x2a6   : > { %v1689_v42 = vld [vmem:[#allocation4 + $0x78] sm:$0xff] }
 0x2a7   : > { %1690 = vmatpush.msrb.mxu1 %v1689_v42  ;;  %v1620_v42 = vpop.permute.xlu2 %1619 }
 0x2a9   : > { %1691 = vmatpush.msrb.mxu1 %v1688_v55  ;;  %v2117_v55 = vsel %vm1509_vm6, 1.0, %v2269_v43 }
 0x2ab   : > { %1692 = vmatpush.msrb.mxu1 %v1687_v34  ;;  %v1653_v34 = vmul.f32 %v2117_v55, %v1620_v42  ;;  %v1673_v42 = vld [vmem:[#allocation2 + $0x78] sm:$0xff] }
 0x2ad   : > { %1693 = vmatpush.msrb.mxu1 %v1686_v46  ;;  %v1488_v46 = vpop.permute.xlu0 %1487 }
 0x2ae   : > { %vm1510_vm7 = vcmp.eq.s32.totalorder %v1488_v46, %v2965_v25 }
 0x2af   : > { %1694 = vmatpush.msrb.mxu1 %v1685_v47  ;;  %v2118_v47 = vsel %vm1510_vm7, 1.0, %v2269_v43 }
 0x2b1   : > { %1695 = vmatpush.msrb.mxu1 %v1684_v40  ;;  %v1625_v40 = vpop.permute.xlu1 %1624 }
 0x2b3   : > { %1696 = vmatpush.msrb.mxu1 %v1683_v48  ;;  %v1491_v48 = vpop.permute.xlu2 %1490 }
 0x2b4   : > { %vm1511_vm8 = vcmp.eq.s32.totalorder %v1491_v48, %v2965_v25 }
 0x2b5   : > { %1697 = vmatpush.msrb.mxu1 %v1682_v62  ;;  %v1654_v62 = vmul.f32 %v2118_v47, %v1625_v40  ;;  %v1630_v49 = vpop.permute.xlu0 %1629 }
 0x2b7   : > { %1698 = vmatpush.msrb.mxu1 %v1681_v30  ;;  %v2119_v30 = vsel %vm1511_vm8, 1.0, %v2269_v43 }
 0x2b9   : > { %1699 = vmatpush.msrb.mxu1 %v1680_v51  ;;  %v1655_v51 = vmul.f32 %v2119_v30, %v1630_v49  ;;  %v1494_v54 = vpop.permute.xlu1 %1493 }
 0x2ba   : > { %vm1512_vm10 = vcmp.eq.s32.totalorder %v1494_v54, %v2965_v25 }
 0x2bb   : > { %1700 = vmatpush.msrb.mxu1 %v1679_v56  ;;  %v1635_v56 = vpop.permute.xlu2 %1634 }
 0x2bd   : > { %1701 = vmatpush.msrb.mxu1 %v1678_v52  ;;  %v2120_v52 = vsel %vm1512_vm10, 1.0, %v2269_v43 }
 0x2bf   : > { %1702 = vmatpush.msrb.mxu1 %v1677_v57  ;;  %v1497_v57 = vpop.permute.xlu0 %1496 }
 0x2c0   : > { %vm1513_vm9 = vcmp.eq.s32.totalorder %v1497_v57, %v2965_v25 }
 0x2c1   : > { %1703 = vmatpush.msrb.mxu1 %v1676_v58  ;;  %v1656_v58 = vmul.f32 %v2120_v52, %v1635_v56  ;;  %v1640_v59 = vpop.permute.xlu1 %1639  ;;  %v2121_v1 = vsel %vm1513_vm9, 1.0, %v2269_v43 }
 0x2c3   : > { %1704 = vmatpush.msrb.mxu1 %v1675_v11  ;;  %v1657_v11 = vmul.f32 %v2121_v1, %v1640_v59 }
 0x2c5   : > { %1705 = vmatpush.msrb.mxu1 %v1674_v3 }
 0x2c6   : > { %1706 = vmatmul.f32.vlgmr.msrb.gmra.mxu1 %v1642_v2 }
 0x2ce   : > { %1709 = vmatmul.f32.gmra.mxu1 %v1643_v6  ;;  %v1660_v6 = vld [vmem:[#allocation2 + $0x10] sm:$0xff] }
 0x2d6   : > { %1712 = vmatmul.f32.gmra.mxu1 %v1644_v0 }
 0x2de   : > { %1715 = vmatmul.f32.gmra.mxu1 %v1645_v60  ;;  %v1663_v60 = vld [vmem:[#allocation2 + $0x28] sm:$0xff] }
 0x2e6   : > { %1718 = vmatmul.f32.gmra.mxu1 %v1646_v15 }
 0x2ee   : > { %1721 = vmatmul.f32.gmra.mxu1 %v1647_v20 }
 0x2f6   : > { %1724 = vmatmul.f32.gmra.mxu1 %v1648_v9  ;;  %v1667_v9 = vld [vmem:[#allocation2 + $0x48] sm:$0xff] }
 0x2fe   : > { %1727 = vmatmul.f32.gmra.mxu1 %v1649_v27 }
 0x306   : > { %1730 = vmatmul.f32.gmra.mxu1 %v1650_v45 }
 0x30e   : > { %1733 = vmatmul.f32.gmra.mxu1 %v1651_v32  ;;  %v1671_v32 = vld [vmem:[#allocation2 + $0x68] sm:$0xff] }
 0x316   : > { %1736 = vmatmul.f32.gmra.mxu1 %v1652_v35 }
 0x31e   : > { %1739 = vmatmul.f32.gmra.mxu1 %v1653_v34 }
 0x326   : > { %1742 = vmatmul.f32.gmra.mxu1 %v1654_v62 }
 0x32e   : > { %1745 = vmatmul.f32.gmra.mxu1 %v1655_v51 }
 0x336   : > { %1748 = vmatmul.f32.gmra.mxu1 %v1656_v58 }
 0x33e   : > { %1751 = vmatmul.f32.gmra.mxu1 %v1657_v11 }
 0x343   : > { %v1707_v2 = vpop.f32.mrf.mxu1 }
 0x344   : > { %v1755_v3 = vadd.f32 %v1707_v2, %v1658_v53 }
 0x346   : > { %1771 = vst.msk [vmem:[#allocation2] sm:$0xff] %vm686_vm1, %v1755_v3 }
 0x34b   : > { %v1710_v5 = vpop.f32.mrf.mxu1 }
 0x34c   : > { %v1756_v61 = vadd.f32 %v1710_v5, %v1659_v4 }
 0x34d   : > { %v1792_v46 = vld [vmem:[#allocation2] sm:$0xff] (%p1787_p6) }
 0x34e   : > { %1772 = vst.msk [vmem:[#allocation2 + $0x8] sm:$0xff] %vm686_vm1, %v1756_v61 }
 0x34f   : > { %1808 = vst.msk [vmem:[%s3098_s7] sm:$0xff] (%p1787_p6), %vm686_vm1, %v1792_v46 }
 0x353   : > { %v1713_v33 = vpop.f32.mrf.mxu1 }
 0x354   : > { %v1757_v25 = vadd.f32 %v1713_v33, %v1660_v6 }
 0x355   : > { %v1793_v47 = vld [vmem:[#allocation2 + $0x8] sm:$0xff] (%p1787_p6) }
 0x356   : > { %1773 = vst.msk [vmem:[#allocation2 + $0x10] sm:$0xff] %vm686_vm1, %v1757_v25 }
 0x357   : > { %1809 = vst.msk [vmem:[%s3098_s7 + $0x8] sm:$0xff] (%p1787_p6), %vm686_vm1, %v1793_v47 }
 0x35b   : > { %v1716_v43 = vpop.f32.mrf.mxu1 }
 0x35c   : > { %v1758_v0 = vadd.f32 %v1716_v43, %v1661_v50 }
 0x35d   : > { %v1794_v40 = vld [vmem:[#allocation2 + $0x10] sm:$0xff] (%p1787_p6) }
 0x35e   : > { %1774 = vst.msk [vmem:[#allocation2 + $0x18] sm:$0xff] %vm686_vm1, %v1758_v0 }
 0x35f   : > { %1810 = vst.msk [vmem:[%s3098_s7 + $0x10] sm:$0xff] (%p1787_p6), %vm686_vm1, %v1794_v40 }
 0x363   : > { %v1719_v12 = vpop.f32.mrf.mxu1 }
 0x364   : > { %v1759_v13 = vadd.f32 %v1719_v12, %v1662_v10 }
 0x365   : > { %v1795_v48 = vld [vmem:[#allocation2 + $0x18] sm:$0xff] (%p1787_p6) }
 0x366   : > { %1775 = vst.msk [vmem:[#allocation2 + $0x20] sm:$0xff] %vm686_vm1, %v1759_v13 }
 0x367   : > { %1811 = vst.msk [vmem:[%s3098_s7 + $0x18] sm:$0xff] (%p1787_p6), %vm686_vm1, %v1795_v48 }
 0x36b   : > { %v1722_v63 = vpop.f32.mrf.mxu1 }
 0x36c   : > { %v1760_v14 = vadd.f32 %v1722_v63, %v1663_v60 }
 0x36d   : > { %v1796_v62 = vld [vmem:[#allocation2 + $0x20] sm:$0xff] (%p1787_p6) }
 0x36e   : > { %1776 = vst.msk [vmem:[#allocation2 + $0x28] sm:$0xff] %vm686_vm1, %v1760_v14 }
 0x36f   : > { %1812 = vst.msk [vmem:[%s3098_s7 + $0x20] sm:$0xff] (%p1787_p6), %vm686_vm1, %v1796_v62 }
 0x373   : > { %v1725_v15 = vpop.f32.mrf.mxu1 }
 0x374   : > { %v1761_v17 = vadd.f32 %v1725_v15, %v1664_v36 }
 0x375   : > { %v1797_v49 = vld [vmem:[#allocation2 + $0x28] sm:$0xff] (%p1787_p6) }
 0x376   : > { %1777 = vst.msk [vmem:[#allocation2 + $0x30] sm:$0xff] %vm686_vm1, %v1761_v17 }
 0x377   : > { %1813 = vst.msk [vmem:[%s3098_s7 + $0x28] sm:$0xff] (%p1787_p6), %vm686_vm1, %v1797_v49 }
 0x37b   : > { %v1728_v19 = vpop.f32.mrf.mxu1 }
 0x37c   : > { %v1762_v20 = vadd.f32 %v1728_v19, %v1665_v7 }
 0x37d   : > { %v1798_v30 = vld [vmem:[#allocation2 + $0x30] sm:$0xff] (%p1787_p6) }
 0x37e   : > { %1778 = vst.msk [vmem:[#allocation2 + $0x38] sm:$0xff] %vm686_vm1, %v1762_v20 }
 0x37f   : > { %1814 = vst.msk [vmem:[%s3098_s7 + $0x30] sm:$0xff] (%p1787_p6), %vm686_vm1, %v1798_v30 }
 0x383   : > { %v1731_v22 = vpop.f32.mrf.mxu1 }
 0x384   : > { %v1763_v23 = vadd.f32 %v1731_v22, %v1666_v21 }
 0x385   : > { %v1799_v51 = vld [vmem:[#allocation2 + $0x38] sm:$0xff] (%p1787_p6) }
 0x386   : > { %1779 = vst.msk [vmem:[#allocation2 + $0x40] sm:$0xff] %vm686_vm1, %v1763_v23 }
 0x387   : > { %1815 = vst.msk [vmem:[%s3098_s7 + $0x38] sm:$0xff] (%p1787_p6), %vm686_vm1, %v1799_v51 }
 0x38b   : > { %v1734_v44 = vpop.f32.mrf.mxu1 }
 0x38c   : > { %v1764_v16 = vadd.f32 %v1734_v44, %v1667_v9 }
 0x38d   : > { %v1800_v54 = vld [vmem:[#allocation2 + $0x40] sm:$0xff] (%p1787_p6) }
 0x38e   : > { %1780 = vst.msk [vmem:[#allocation2 + $0x48] sm:$0xff] %vm686_vm1, %v1764_v16 }
 0x38f   : > { %1816 = vst.msk [vmem:[%s3098_s7 + $0x40] sm:$0xff] (%p1787_p6), %vm686_vm1, %v1800_v54 }
 0x393   : > { %v1737_v27 = vpop.f32.mrf.mxu1 }
 0x394   : > { %v1765_v18 = vadd.f32 %v1737_v27, %v1668_v26 }
 0x395   : > { %v1801_v56 = vld [vmem:[#allocation2 + $0x48] sm:$0xff] (%p1787_p6) }
 0x396   : > { %1781 = vst.msk [vmem:[#allocation2 + $0x50] sm:$0xff] %vm686_vm1, %v1765_v18 }
 0x397   : > { %1817 = vst.msk [vmem:[%s3098_s7 + $0x48] sm:$0xff] (%p1787_p6), %vm686_vm1, %v1801_v56 }
 0x39b   : > { %v1740_v31 = vpop.f32.mrf.mxu1 }
 0x39c   : > { %v1766_v45 = vadd.f32 %v1740_v31, %v1669_v28 }
 0x39d   : > { %v1802_v52 = vld [vmem:[#allocation2 + $0x50] sm:$0xff] (%p1787_p6) }
 0x39e   : > { %1782 = vst.msk [vmem:[#allocation2 + $0x58] sm:$0xff] %vm686_vm1, %v1766_v45 }
 0x39f   : > { %1818 = vst.msk [vmem:[%s3098_s7 + $0x50] sm:$0xff] (%p1787_p6), %vm686_vm1, %v1802_v52 }
 0x3a3   : > { %v1743_v29 = vpop.f32.mrf.mxu1 }
 0x3a4   : > { %v1767_v8 = vadd.f32 %v1743_v29, %v1670_v24 }
 0x3a5   : > { %v1803_v57 = vld [vmem:[#allocation2 + $0x58] sm:$0xff] (%p1787_p6) }
 0x3a6   : > { %1783 = vst.msk [vmem:[#allocation2 + $0x60] sm:$0xff] %vm686_vm1, %v1767_v8 }
 0x3a7   : > { %1819 = vst.msk [vmem:[%s3098_s7 + $0x58] sm:$0xff] (%p1787_p6), %vm686_vm1, %v1803_v57 }
 0x3ab   : > { %v1746_v37 = vpop.f32.mrf.mxu1 }
 0x3ac   : > { %v1768_v38 = vadd.f32 %v1746_v37, %v1671_v32 }
 0x3ad   : > { %v1804_v58 = vld [vmem:[#allocation2 + $0x60] sm:$0xff] (%p1787_p6) }
 0x3ae   : > { %1784 = vst.msk [vmem:[#allocation2 + $0x68] sm:$0xff] %vm686_vm1, %v1768_v38 }
 0x3af   : > { %1820 = vst.msk [vmem:[%s3098_s7 + $0x60] sm:$0xff] (%p1787_p6), %vm686_vm1, %v1804_v58 }
 0x3b3   : > { %v1749_v35 = vpop.f32.mrf.mxu1 }
 0x3b4   : > { %v1769_v41 = vadd.f32 %v1749_v35, %v1672_v39 }
 0x3b5   : > { %v1805_v59 = vld [vmem:[#allocation2 + $0x68] sm:$0xff] (%p1787_p6) }
 0x3b6   : > { %1785 = vst.msk [vmem:[#allocation2 + $0x70] sm:$0xff] %vm686_vm1, %v1769_v41 }
 0x3b7   : > { %1821 = vst.msk [vmem:[%s3098_s7 + $0x68] sm:$0xff] (%p1787_p6), %vm686_vm1, %v1805_v59 }
 0x3ba   : > { %1791 = sbr.rel (!%p1787_p6) target bundleno = 967 (0x3c7), region = 64 }
 0x3bb   : > { %v1752_v55 = vpop.f32.mrf.mxu1 }
 0x3bc   : > { %v1770_v34 = vadd.f32 %v1752_v55, %v1673_v42 }
 0x3bd   : > { %v1806_v1 = vld [vmem:[#allocation2 + $0x70] sm:$0xff] (%p1787_p6) }
 0x3be   : > { %1786 = vst.msk [vmem:[#allocation2 + $0x78] sm:$0xff] %vm686_vm1, %v1770_v34 }
 0x3bf   : > { %1822 = vst.msk [vmem:[%s3098_s7 + $0x70] sm:$0xff] %vm686_vm1, %v1806_v1 }
 0x3c5   : > { %v1807_v11 = vld [vmem:[#allocation2 + $0x78] sm:$0xff] }
 0x3c6   : > { %1823 = vst.msk [vmem:[%s3098_s7 + $0x78] sm:$0xff] %vm686_vm1, %v1807_v11 }
 0x3c7 PF: > { %s17_s26 = sadd.s32 1, %s2264_s26   ;;  %s3113_s24 = smov %s2260_s25 }
 0x3c8   : > { %p14_p7 = scmp.ge.s32.totalorder %s17_s26, 10   ;;  %s3114_s25 = smov %s3116_s27 }
 0x3ca   :  { %16 = sbr.rel (!%p14_p7) target bundleno = 2 (0x2), region = 112 }

</bundles_post_ra>
